<compile_context>
chip_gen: v5e
topology: v5e:2x2
jax: 0.10.0
libtpu: 0.0.40
codegen_flags: <defaults>
</compile_context>

<pallas_src>
import functools

import jax
import jax.numpy as jnp
from jax.experimental import pallas as pl
from jax.experimental.pallas import tpu as pltpu


def _round_up(v, m):
    return ((v + m - 1) // m) * m


def _vmem_block_bytes(rows, cols, itemsize):
    # VMEM tiles are (8, 128); a 2-D block is padded up to those granularities.
    return _round_up(rows, 8) * _round_up(cols, 128) * itemsize


def discriminator_kernel(x_ref, w1_ref, b1_ref, w2_ref, b2_ref, w3_ref, b3_ref,
                         o_ref, *, compute_dtype, epilogue_dtype):
    # In-register cast (no extra XLA pad/cast pass over x in the wrapper).
    x = x_ref[...].astype(compute_dtype)

    # Linear(input_dim, 256): MXU matmul, f32 accumulation, bias add in f32.
    h1 = jnp.dot(x, w1_ref[...].astype(compute_dtype),
                 preferred_element_type=jnp.float32) + b1_ref[...]
    h1 = h1.astype(epilogue_dtype)
    h1 = jnp.maximum(h1, 0.2 * h1)                       # LeakyReLU(0.2)

    # Linear(256, 128)
    h2 = jnp.dot(h1.astype(compute_dtype), w2_ref[...].astype(compute_dtype),
                 preferred_element_type=jnp.float32) + b2_ref[...]
    h2 = h2.astype(epilogue_dtype)
    h2 = jnp.maximum(h2, 0.2 * h2)                       # LeakyReLU(0.2)

    # Linear(128, 1): degenerate N=1 matmul done as a VPU multiply + XLU lane
    # reduction (w3 arrives as a (1, 128) f32 row) instead of an MXU pass.
    logit = (jnp.sum(h2.astype(jnp.float32) * w3_ref[...],
                     axis=-1, keepdims=True) + b3_ref[...])

    # Numerically stable sigmoid with an exact divide (the logit tensor is only
    # (tb, 1) wide, so the exact divide costs nothing; no overflow for strongly
    # negative logits).
    z = jnp.exp(-jnp.abs(logit))
    prob = jnp.where(logit >= 0, 1.0 / (1.0 + z), z / (1.0 + z))

    # Minimal-byte writeback: (tb, 1) block of a (B, 1) output.
    o_ref[...] = prob.astype(o_ref.dtype)


def discriminator_forward(x, params, *, tb=512,
                          compute_dtype=jnp.bfloat16,
                          epilogue_dtype=jnp.float32):
    """x: (B, input_dim) float32. Returns (B, 1) float32 probabilities."""
    w1, b1, w2, b2, w3, b3 = params
    B, D = x.shape
    H1 = w1.shape[1]           # 256
    H2 = w2.shape[1]           # 128

    # Batch tile: multiple of 16 (bf16 sublane packing). Default 512 amortizes
    # the ~0.35us/grid-step overhead; shrink if the batch is small, and keep
    # >= ~8 grid steps for big batches so both v7x cores stay busy & pipelined.
    tb = max(16, _round_up(int(tb), 16))
    if B >= 8 * 128:
        tb = min(tb, max(128, _round_up(pl.cdiv(B, 8), 16)))
    tb = min(tb, _round_up(B, 16))
    nb = pl.cdiv(B, tb)

    # Tiny reshapes only -- no pad / cast pass over x or the big weights.
    b1_r = b1.reshape(1, H1).astype(jnp.float32)
    b2_r = b2.reshape(1, H2).astype(jnp.float32)
    w3_row = w3.reshape(1, H2).astype(jnp.float32)
    b3_r = b3.reshape(1, 1).astype(jnp.float32)

    # Single-buffer the resident weight tiles only once they are big enough for
    # the duplicate buffer to matter (their index_map is constant, so one DMA
    # suffices either way; this just trims VMEM footprint, relevant on v7x).
    w_itemsize = jnp.dtype(w1.dtype).itemsize
    w1_bytes = _vmem_block_bytes(D, H1, w_itemsize)
    if w1_bytes > (8 << 20):
        weight_spec_kwargs = dict(pipeline_mode=pl.Buffered(1))
        w_bufs = 1
    else:
        weight_spec_kwargs = {}
        w_bufs = 2

    in_specs = [
        pl.BlockSpec((tb, D), lambda i: (i, 0)),                 # x tile (raw f32)
        pl.BlockSpec((D, H1), lambda i: (0, 0), **weight_spec_kwargs),   # W1
        pl.BlockSpec((1, H1), lambda i: (0, 0)),                 # b1
        pl.BlockSpec((H1, H2), lambda i: (0, 0), **weight_spec_kwargs),  # W2
        pl.BlockSpec((1, H2), lambda i: (0, 0)),                 # b2
        pl.BlockSpec((1, H2), lambda i: (0, 0)),                 # W3 as a row
        pl.BlockSpec((1, 1), lambda i: (0, 0)),                  # b3
    ]
    out_spec = pl.BlockSpec((tb, 1), lambda i: (i, 0))           # minimal writeback

    x_itemsize = jnp.dtype(x.dtype).itemsize

    # Derive the VMEM limit from the real footprint (+ headroom) instead of
    # hard-coding the whole of a v7x core's 64 MiB.
    vmem_needed = (
        2 * _vmem_block_bytes(tb, D, x_itemsize)                 # x (double-buffered)
        + w_bufs * _vmem_block_bytes(D, H1, w_itemsize)          # W1
        + w_bufs * _vmem_block_bytes(H1, H2, w_itemsize)         # W2
        + 2 * (_vmem_block_bytes(1, H1, 4) + 2 * _vmem_block_bytes(1, H2, 4)
               + _vmem_block_bytes(1, 1, 4))                     # biases + w3 row
        + 2 * _vmem_block_bytes(tb, 1, 4)                        # output block
        # live intermediates (h1/h2 + casted copies) + compiler scratch
        + 4 * _vmem_block_bytes(tb, H1, 4)
        + 4 * _vmem_block_bytes(tb, H2, 4)
    )
    vmem_limit = max(int(vmem_needed) + (8 << 20), 16 << 20)

    rows = nb * tb   # rows actually processed (incl. ragged-tile padding)
    cost = pl.CostEstimate(
        flops=2 * rows * (D * H1 + H1 * H2 + H2),
        transcendentals=rows,
        bytes_accessed=(B * D * x_itemsize
                        + (D * H1 + H1 * H2) * w_itemsize
                        + (H1 + 2 * H2 + 1) * 4
                        + B * 4),
    )

    kernel = functools.partial(discriminator_kernel,
                               compute_dtype=compute_dtype,
                               epilogue_dtype=epilogue_dtype)

    out = pl.pallas_call(
        kernel,
        out_shape=jax.ShapeDtypeStruct((B, 1), jnp.float32),
        grid_spec=pltpu.PrefetchScalarGridSpec(
            num_scalar_prefetch=0,
            grid=(nb,),
            in_specs=in_specs,
            out_specs=out_spec,
        ),
        compiler_params=pltpu.CompilerParams(
            dimension_semantics=("parallel",),
            vmem_limit_bytes=vmem_limit,
        ),
        cost_estimate=cost,
    )(x, w1, b1_r, w2, b2_r, w3_row, b3_r)

    return out


def init_params(key, input_dim):
    """Deterministic init mimicking nn.Linear's U(-1/sqrt(fan_in), +1/sqrt(fan_in))."""
    dims = [(input_dim, 256), (256, 128), (128, 1)]
    params = []
    for fan_in, fan_out in dims:
        kw, kb, key = jax.random.split(key, 3)
        bound = 1.0 / jnp.sqrt(jnp.float32(fan_in))
        w = jax.random.uniform(kw, (fan_in, fan_out), jnp.float32, -bound, bound)
        b = jax.random.uniform(kb, (1, fan_out), jnp.float32, -bound, bound)
        params.extend([w, b])
    return tuple(params)


def reference_forward(x, params):
    w1, b1, w2, b2, w3, b3 = params
    h = jnp.dot(x, w1) + b1
    h = jnp.where(h > 0, h, 0.2 * h)
    h = jnp.dot(h, w2) + b2
    h = jnp.where(h > 0, h, 0.2 * h)
    h = jnp.dot(h, w3) + b3
    return jax.nn.sigmoid(h)


if __name__ == "__main__":
    key = jax.random.PRNGKey(0)
    k_x, k_p = jax.random.split(key)

    batch = 300       # deliberately NOT a multiple of the batch tile (ragged tile path)
    input_dim = 100   # deliberately NOT a multiple of 128 (unaligned-K path)

    x = jax.random.normal(k_x, (batch, input_dim), dtype=jnp.float32)
    params = init_params(k_p, input_dim)
    ref = reference_forward(x, params)

    # Default path: bf16 matmuls (f32 accumulation), f32 elementwise epilogue.
    out_bf16 = jax.block_until_ready(discriminator_forward(x, params))
    assert out_bf16.shape == (batch, 1)
    assert jnp.allclose(out_bf16, ref, atol=2e-2, rtol=2e-2), "bf16 mismatch vs reference"

    # Full f32 path -- tighter tolerance now that the sigmoid uses an exact divide.
    out_f32 = jax.block_until_ready(
        discriminator_forward(x, params, compute_dtype=jnp.float32))
    assert out_f32.shape == (batch, 1)
    assert jnp.allclose(out_f32, ref, atol=5e-3, rtol=5e-3), "f32 mismatch vs reference"

    # Multi-step grid + ragged final tile (exercises the batch index map).
    out_multi = jax.block_until_ready(discriminator_forward(x, params, tb=128))
    assert out_multi.shape == (batch, 1)
    assert jnp.allclose(out_multi, ref, atol=2e-2, rtol=2e-2), "tiled mismatch vs reference"

    print("KERNEL_OK")
</pallas_src>

<mosaic_0001>
module attributes {stable_mosaic.version = 11 : i64} {
  func.func @discriminator_kernel(%arg0: i32, %arg1: memref<304x100xf32, #tpu.memory_space<vmem>>, %arg2: memref<100x256xf32, #tpu.memory_space<vmem>>, %arg3: memref<1x256xf32, #tpu.memory_space<vmem>>, %arg4: memref<256x128xf32, #tpu.memory_space<vmem>>, %arg5: memref<1x128xf32, #tpu.memory_space<vmem>>, %arg6: memref<1x128xf32, #tpu.memory_space<vmem>>, %arg7: memref<1x1xf32, #tpu.memory_space<vmem>>, %arg8: memref<304x1xf32, #tpu.memory_space<vmem>>) attributes {dimension_semantics = [#tpu.dimension_semantics<parallel>], iteration_bounds = array<i64: 1>, scalar_prefetch = 0 : i64, scratch_operands = 0 : i64, tpu.core_type = #tpu.core_type<tc>, window_params = [{transform_indices = @transform_0, window_bounds = array<i64: 304, 100>}, {pipeline_mode = #tpu.pipeline_mode<synchronous>, transform_indices = @transform_1, window_bounds = array<i64: 100, 256>}, {pipeline_mode = #tpu.pipeline_mode<synchronous>, transform_indices = @transform_2, window_bounds = array<i64: 1, 256>}, {pipeline_mode = #tpu.pipeline_mode<synchronous>, transform_indices = @transform_3, window_bounds = array<i64: 256, 128>}, {pipeline_mode = #tpu.pipeline_mode<synchronous>, transform_indices = @transform_4, window_bounds = array<i64: 1, 128>}, {pipeline_mode = #tpu.pipeline_mode<synchronous>, transform_indices = @transform_5, window_bounds = array<i64: 1, 128>}, {pipeline_mode = #tpu.pipeline_mode<synchronous>, transform_indices = @transform_6, window_bounds = array<i64: 1, 1>}, {transform_indices = @transform_7, window_bounds = array<i64: 304, 1>}]} {
    %c0 = arith.constant 0 : index
    %c0_0 = arith.constant 0 : index
    %0 = vector.load %arg1[%c0, %c0_0] : memref<304x100xf32, #tpu.memory_space<vmem>>, vector<304x100xf32>
    %1 = arith.truncf %0 : vector<304x100xf32> to vector<304x100xbf16>
    %c0_1 = arith.constant 0 : index
    %c0_2 = arith.constant 0 : index
    %2 = vector.load %arg2[%c0_1, %c0_2] : memref<100x256xf32, #tpu.memory_space<vmem>>, vector<100x256xf32>
    %3 = arith.truncf %2 : vector<100x256xf32> to vector<100x256xbf16>
    %cst = arith.constant dense<0.000000e+00> : vector<304x256xf32>
    %4 = tpu.matmul %1, %3, %cst {dimension_numbers = #tpu.dot_dimension_numbers<[1], [0], [0], [1], [0, 0, 1, 1], [], []>} : vector<304x100xbf16>, vector<100x256xbf16>, vector<304x256xf32> -> vector<304x256xf32>
    %c0_3 = arith.constant 0 : index
    %c0_4 = arith.constant 0 : index
    %5 = vector.load %arg3[%c0_3, %c0_4] : memref<1x256xf32, #tpu.memory_space<vmem>>, vector<1x256xf32>
    %6 = vector.broadcast %5 : vector<1x256xf32> to vector<304x256xf32>
    %7 = arith.addf %4, %6 : vector<304x256xf32>
    %cst_5 = arith.constant 2.000000e-01 : f32
    %8 = vector.broadcast %cst_5 : f32 to vector<304x256xf32>
    %9 = arith.mulf %8, %7 : vector<304x256xf32>
    %10 = arith.maximumf %7, %9 : vector<304x256xf32>
    %11 = arith.truncf %10 : vector<304x256xf32> to vector<304x256xbf16>
    %c0_6 = arith.constant 0 : index
    %c0_7 = arith.constant 0 : index
    %12 = vector.load %arg4[%c0_6, %c0_7] : memref<256x128xf32, #tpu.memory_space<vmem>>, vector<256x128xf32>
    %13 = arith.truncf %12 : vector<256x128xf32> to vector<256x128xbf16>
    %cst_8 = arith.constant dense<0.000000e+00> : vector<304x128xf32>
    %14 = tpu.matmul %11, %13, %cst_8 {dimension_numbers = #tpu.dot_dimension_numbers<[1], [0], [0], [1], [0, 0, 1, 1], [], []>} : vector<304x256xbf16>, vector<256x128xbf16>, vector<304x128xf32> -> vector<304x128xf32>
    %c0_9 = arith.constant 0 : index
    %c0_10 = arith.constant 0 : index
    %15 = vector.load %arg5[%c0_9, %c0_10] : memref<1x128xf32, #tpu.memory_space<vmem>>, vector<1x128xf32>
    %16 = vector.broadcast %15 : vector<1x128xf32> to vector<304x128xf32>
    %17 = arith.addf %14, %16 : vector<304x128xf32>
    %cst_11 = arith.constant 2.000000e-01 : f32
    %18 = vector.broadcast %cst_11 : f32 to vector<304x128xf32>
    %19 = arith.mulf %18, %17 : vector<304x128xf32>
    %20 = arith.maximumf %17, %19 : vector<304x128xf32>
    %c0_12 = arith.constant 0 : index
    %c0_13 = arith.constant 0 : index
    %21 = vector.load %arg6[%c0_12, %c0_13] : memref<1x128xf32, #tpu.memory_space<vmem>>, vector<1x128xf32>
    %22 = vector.broadcast %21 : vector<1x128xf32> to vector<304x128xf32>
    %23 = arith.mulf %20, %22 : vector<304x128xf32>
    %cst_14 = arith.constant dense<0.000000e+00> : vector<304xf32>
    %24 = vector.multi_reduction <add>, %23, %cst_14 [1] : vector<304x128xf32> to vector<304xf32>
    %25 = vector.shape_cast %24 : vector<304xf32> to vector<304x1xf32>
    %c0_15 = arith.constant 0 : index
    %c0_16 = arith.constant 0 : index
    %26 = vector.load %arg7[%c0_15, %c0_16] : memref<1x1xf32, #tpu.memory_space<vmem>>, vector<1x1xf32>
    %27 = vector.broadcast %26 : vector<1x1xf32> to vector<304x1xf32>
    %28 = arith.addf %25, %27 : vector<304x1xf32>
    %29 = math.absf %28 : vector<304x1xf32>
    %cst_17 = arith.constant 0.000000e+00 : f32
    %30 = vector.broadcast %cst_17 : f32 to vector<304x1xf32>
    %31 = arith.subf %30, %29 : vector<304x1xf32>
    %32 = math.exp %31 : vector<304x1xf32>
    %cst_18 = arith.constant 0.000000e+00 : f32
    %33 = vector.broadcast %cst_18 : f32 to vector<304x1xf32>
    %34 = arith.cmpf oge, %28, %33 : vector<304x1xf32>
    %cst_19 = arith.constant 1.000000e+00 : f32
    %35 = vector.broadcast %cst_19 : f32 to vector<304x1xf32>
    %36 = arith.addf %35, %32 : vector<304x1xf32>
    %cst_20 = arith.constant 1.000000e+00 : f32
    %37 = vector.broadcast %cst_20 : f32 to vector<304x1xf32>
    %38 = arith.divf %37, %36 : vector<304x1xf32>
    %cst_21 = arith.constant 1.000000e+00 : f32
    %39 = vector.broadcast %cst_21 : f32 to vector<304x1xf32>
    %40 = arith.addf %39, %32 : vector<304x1xf32>
    %41 = arith.divf %32, %40 : vector<304x1xf32>
    %42 = arith.select %34, %38, %41 : vector<304x1xi1>, vector<304x1xf32>
    %c0_22 = arith.constant 0 : index
    %c0_23 = arith.constant 0 : index
    %43 = vector.load %arg8[%c0_22, %c0_23] : memref<304x1xf32, #tpu.memory_space<vmem>>, vector<304x1xf32>
    tpu.vector_store %arg8[%c0_22, %c0_23], %42 {strides = array<i32>} : memref<304x1xf32, #tpu.memory_space<vmem>>, vector<304x1xf32>,
    return
  }
  func.func @transform_0(%arg0: i32) -> (i32, i32) {
    %c0_i32 = arith.constant 0 : i32
    %c0_i32_0 = arith.constant 0 : i32
    return %arg0, %c0_i32 : i32, i32
  }
  func.func @transform_1(%arg0: i32) -> (i32, i32) {
    %c0_i32 = arith.constant 0 : i32
    %c0_i32_0 = arith.constant 0 : i32
    %c0_i32_1 = arith.constant 0 : i32
    return %c0_i32, %c0_i32_0 : i32, i32
  }
  func.func @transform_2(%arg0: i32) -> (i32, i32) {
    %c0_i32 = arith.constant 0 : i32
    %c0_i32_0 = arith.constant 0 : i32
    %c0_i32_1 = arith.constant 0 : i32
    return %c0_i32, %c0_i32_0 : i32, i32
  }
  func.func @transform_3(%arg0: i32) -> (i32, i32) {
    %c0_i32 = arith.constant 0 : i32
    %c0_i32_0 = arith.constant 0 : i32
    %c0_i32_1 = arith.constant 0 : i32
    return %c0_i32, %c0_i32_0 : i32, i32
  }
  func.func @transform_4(%arg0: i32) -> (i32, i32) {
    %c0_i32 = arith.constant 0 : i32
    %c0_i32_0 = arith.constant 0 : i32
    %c0_i32_1 = arith.constant 0 : i32
    return %c0_i32, %c0_i32_0 : i32, i32
  }
  func.func @transform_5(%arg0: i32) -> (i32, i32) {
    %c0_i32 = arith.constant 0 : i32
    %c0_i32_0 = arith.constant 0 : i32
    %c0_i32_1 = arith.constant 0 : i32
    return %c0_i32, %c0_i32_0 : i32, i32
  }
  func.func @transform_6(%arg0: i32) -> (i32, i32) {
    %c0_i32 = arith.constant 0 : i32
    %c0_i32_0 = arith.constant 0 : i32
    %c0_i32_1 = arith.constant 0 : i32
    return %c0_i32, %c0_i32_0 : i32, i32
  }
  func.func @transform_7(%arg0: i32) -> (i32, i32) {
    %c0_i32 = arith.constant 0 : i32
    %c0_i32_0 = arith.constant 0 : i32
    return %arg0, %c0_i32 : i32, i32
  }
}

</mosaic_0001>

<bundles_post_ra>
// kernel: tpu_custom_call.1
= control target key start
LH: loop header
LB: loop body
LE: loop exit
PB: predicated region body
PF: predicated region fallthrough
CT: control target
= control target key end

     0   :  { %s3266_s0 = inlined_call_operand.hbm [shape: f32[300,100], index: 0, kind: input, shape index: {}]   ;;  %s3267_s1 = inlined_call_operand.hbm [shape: f32[100,256], index: 1, kind: input, shape index: {}]   ;;  %s3268_s2 = inlined_call_operand.vmem [shape: f32[1,256], index: 2, kind: input, shape index: {}]   ;;  %s3269_s3 = inlined_call_operand.hbm [shape: f32[256,128], index: 3, kind: input, shape index: {}]   ;;  %s3270_s4 = inlined_call_operand.vmem [shape: f32[1,128], index: 4, kind: input, shape index: {}]   ;;  %s3271_s5 = inlined_call_operand.vmem [shape: f32[1,128], index: 5, kind: input, shape index: {}]   ;;  %s3272_s6 = inlined_call_operand.<no memory space> [shape: f32[1,1], index: 6, kind: input, shape index: {}]   ;;  %s3273_s7 = inlined_call_operand.vmem [shape: f32[300,1], index: 7, kind: output, shape index: {}]  }
   0x1   :  { %v12_v0 = vstv %s3272_s6 }
   0x2   :  { %13 = vst [vmem:[#allocation2] sm:$0x1] %v12_v0 }
   0x3   :  { %14 = vsyncpa [#allocation4], 0 }
   0x4   :  { %15 = vsyncpa [#allocation6], 0  ;;  %s33_s28 = sshll.u32 %s3267_s1, 4  ;;  %s2337_s29 = smov [#allocation5]   ;;  %s34_s28 = int_to_ptr.hbm [resolvable:$true] %s33_s28 }
   0x5   :  { %s35_s30 = sshll.u32 %s2337_s29, 4  ;;  %s20_s10 = sshll.u32 %s3266_s0, 4  ;;  %s36_s30 = int_to_ptr.vmem [resolvable:$true] %s35_s30  ;;  %s21_s10 = int_to_ptr.hbm [resolvable:$true] %s20_s10 }
   0x6   :  { %s2338_s11 = smov 256   ;;  %s2339_s12 = smov 16  }
   0x7   :  { %41 = dma.hbm_to_vmem [thread:$0]  %s34_s28, 3328, %s36_s30, [#allocation6], %s2338_s11, %s2338_s11, %s2339_s12  }
   0x8   :  { %s2340_s6 = smov [#allocation3]   ;;  %s2341_s14 = smov 128  }
   0x9   :  { %s22_s13 = sshll.u32 %s2340_s6, 4  ;;  %s2342_s15 = smov 8   ;;  %s23_s13 = int_to_ptr.vmem [resolvable:$true] %s22_s13 }
   0xa   :  { %28 = dma.hbm_to_vmem [thread:$0]  %s21_s10, 4864, %s23_s13, [#allocation4], %s2341_s14, %s2341_s14, %s2342_s15  }
   0xb   :  { %s48_s17 = sshll.u32 %s3269_s3, 4  ;;  %s2343_s18 = smov [#allocation7]   ;;  %s49_s17 = int_to_ptr.hbm [resolvable:$true] %s48_s17 }
   0xc   :  { %s50_s19 = sshll.u32 %s2343_s18, 4  ;;  %s51_s19 = int_to_ptr.vmem [resolvable:$true] %s50_s19 }
   0xd   :  { %56 = dma.hbm_to_vmem [thread:$0]  %s49_s17, 4096, %s51_s19, [#allocation6], %s2341_s14, %s2341_s14, %s2342_s15  }
   0xe   :  { %2333 = dma.done.wait [#allocation4], 4864  }
   0xf   :  { %2334 = vsyncadd [#allocation4], 4294962432 }
  0x10   :  { %2335 = dma.done.wait [#allocation6], 7424  }
  0x11   :  { %2336 = vsyncadd [#allocation6], 4294959872  ;;  %v157_v1 = vld [vmem:[#allocation5 + $0xc0] sm:$0xf]  ;;  %vm237_vm0 = vcmask 1041408   ;;  %v155_v6 = vld [vmem:[#allocation5 + $0xb0] sm:$0xff] }
  0x12   :  { %v158_v2 = vld [vmem:[#allocation5 + $0xc8] sm:$0xf]  ;;  %v153_v3 = vld [vmem:[#allocation5 + $0xa0] sm:$0xff]  ;;  %v171_v4 = vpack.c.bf16 %v157_v1, %v157_v1  ;;  %v156_v8 = vld [vmem:[#allocation5 + $0xb8] sm:$0xff]  ;;  %vm179_vm1 = vcmask 818176   ;;  %vm2012_vm6 = vcmask 7168  }
  0x13   :  { %v172_v5 = vpack.c.bf16 %v158_v2, %v158_v2  ;;  %v154_v7 = vld [vmem:[#allocation5 + $0xa8] sm:$0xff]  ;;  %v169_v11 = vpack.c.bf16 %v155_v6, %v153_v3  ;;  %v149_v13 = vld [vmem:[#allocation5 + $0x80] sm:$0xff]  ;;  %v151_v14 = vld [vmem:[#allocation5 + $0x90] sm:$0xff] }
  0x14   :  { %v239_v9 = vsel %vm237_vm0, %v171_v4, 0  ;;  %v170_v12 = vpack.c.bf16 %v156_v8, %v154_v7  ;;  %v150_v15 = vld [vmem:[#allocation5 + $0x88] sm:$0xff]  ;;  %v152_v16 = vld [vmem:[#allocation5 + $0x98] sm:$0xff]  ;;  %v167_v17 = vpack.c.bf16 %v151_v14, %v149_v13  ;;  %v145_v19 = vld [vmem:[#allocation5 + $0x60] sm:$0xff] }
  0x15   :  { %v242_v10 = vsel %vm237_vm0, %v172_v5, 0  ;;  %245 = vmatpush.bf16.msra.mxu0 %v239_v9  ;;  %v168_v18 = vpack.c.bf16 %v152_v16, %v150_v15  ;;  %v147_v20 = vld [vmem:[#allocation5 + $0x70] sm:$0xff]  ;;  %v146_v21 = vld [vmem:[#allocation5 + $0x68] sm:$0xff]  ;;  %v148_v22 = vld [vmem:[#allocation5 + $0x78] sm:$0xff] }
  0x16   :  { %349 = vmatpush.bf16.msra.mxu1 %v242_v10  ;;  %v165_v23 = vpack.c.bf16 %v147_v20, %v145_v19  ;;  %v166_v24 = vpack.c.bf16 %v148_v22, %v146_v21  ;;  %v141_v25 = vld [vmem:[#allocation5 + $0x40] sm:$0xff]  ;;  %v143_v26 = vld [vmem:[#allocation5 + $0x50] sm:$0xff]  ;;  %v142_v27 = vld [vmem:[#allocation5 + $0x48] sm:$0xff] }
  0x17   :  { %v144_v28 = vld [vmem:[#allocation5 + $0x58] sm:$0xff]  ;;  %v163_v29 = vpack.c.bf16 %v143_v26, %v141_v25  ;;  %v137_v31 = vld [vmem:[#allocation5 + $0x20] sm:$0xff]  ;;  %v139_v32 = vld [vmem:[#allocation5 + $0x30] sm:$0xff] }
  0x18   :  { %v164_v30 = vpack.c.bf16 %v144_v28, %v142_v27  ;;  %v138_v33 = vld [vmem:[#allocation5 + $0x28] sm:$0xff]  ;;  %v140_v34 = vld [vmem:[#allocation5 + $0x38] sm:$0xff]  ;;  %v161_v35 = vpack.c.bf16 %v139_v32, %v137_v31  ;;  %v133_v37 = vld [vmem:[#allocation5] sm:$0xff] }
  0x19   :  { %246 = vmatpush.bf16.msra.mxu0 %v169_v11  ;;  %v162_v36 = vpack.c.bf16 %v140_v34, %v138_v33  ;;  %v135_v38 = vld [vmem:[#allocation5 + $0x10] sm:$0xff]  ;;  %v134_v39 = vld [vmem:[#allocation5 + $0x8] sm:$0xff]  ;;  %v136_v40 = vld [vmem:[#allocation5 + $0x18] sm:$0xff] }
  0x1a   :  { %350 = vmatpush.bf16.msra.mxu1 %v170_v12  ;;  %v159_v41 = vpack.c.bf16 %v135_v38, %v133_v37  ;;  %v160_v42 = vpack.c.bf16 %v136_v40, %v134_v39  ;;  %v76_v43 = vld [vmem:[#allocation3] sm:$0xff]  ;;  %v77_v44 = vld [vmem:[#allocation3 + $0x8] sm:$0xff]  ;;  %v78_v46 = vld [vmem:[#allocation3 + $0x10] sm:$0xff] }
  0x1b   :  { %v114_v45 = vpack.c.bf16 %v77_v44, %v76_v43  ;;  %v79_v47 = vld [vmem:[#allocation3 + $0x18] sm:$0xff]  ;;  %v80_v49 = vld [vmem:[#allocation3 + $0x20] sm:$0xff]  ;;  %v81_v50 = vld [vmem:[#allocation3 + $0x28] sm:$0xff] }
  0x1c   :  { %v115_v48 = vpack.c.bf16 %v79_v47, %v78_v46  ;;  %v116_v51 = vpack.c.bf16 %v81_v50, %v80_v49  ;;  %v82_v52 = vld [vmem:[#allocation3 + $0x30] sm:$0xff]  ;;  %v83_v53 = vld [vmem:[#allocation3 + $0x38] sm:$0xff]  ;;  %v84_v55 = vld [vmem:[#allocation3 + $0x40] sm:$0xff] }
  0x1d   :  { %247 = vmatpush.bf16.msra.mxu0 %v167_v17  ;;  %v117_v54 = vpack.c.bf16 %v83_v53, %v82_v52  ;;  %v85_v56 = vld [vmem:[#allocation3 + $0x48] sm:$0xff]  ;;  %v656_v58 = vld [vmem:[#allocation7 + $0x70] sm:$0xff]  ;;  %v657_v59 = vld [vmem:[#allocation7 + $0x78] sm:$0xff] }
  0x1e   :  { %351 = vmatpush.bf16.msra.mxu1 %v168_v18  ;;  %v118_v57 = vpack.c.bf16 %v85_v56, %v84_v55  ;;  %v672_v60 = vld [vmem:[#allocation7 + $0xf0] sm:$0xff]  ;;  %v681_v61 = vpack.c.bf16 %v657_v59, %v656_v58  ;;  %v673_v62 = vld [vmem:[#allocation7 + $0xf8] sm:$0xff]  ;;  %v654_v3 = vld [vmem:[#allocation7 + $0x60] sm:$0xff] }
  0x1f   :  { %v689_v63 = vpack.c.bf16 %v673_v62, %v672_v60  ;;  %v86_v0 = vld [vmem:[#allocation3 + $0x50] sm:$0xff]  ;;  %v87_v1 = vld [vmem:[#allocation3 + $0x58] sm:$0xff]  ;;  %v655_v4 = vld [vmem:[#allocation7 + $0x68] sm:$0xff] }
  0x20   :  { %694 = vmatpush.bf16.msra.mxu2 %v681_v61  ;;  %v119_v2 = vpack.c.bf16 %v87_v1, %v86_v0  ;;  %v670_v5 = vld [vmem:[#allocation7 + $0xe0] sm:$0xff]  ;;  %v680_v6 = vpack.c.bf16 %v655_v4, %v654_v3  ;;  %v671_v7 = vld [vmem:[#allocation7 + $0xe8] sm:$0xff]  ;;  %v652_v8 = vld [vmem:[#allocation7 + $0x50] sm:$0xff] }
  0x21   :  { %248 = vmatpush.bf16.msra.mxu0 %v165_v23  ;;  %798 = vmatpush.bf16.msra.mxu3 %v689_v63  ;;  %v653_v9 = vld [vmem:[#allocation7 + $0x58] sm:$0xff]  ;;  %v688_v10 = vpack.c.bf16 %v671_v7, %v670_v5  ;;  %v668_v11 = vld [vmem:[#allocation7 + $0xd0] sm:$0xff]  ;;  %v650_v15 = vld [vmem:[#allocation7 + $0x40] sm:$0xff] }
  0x22   :  { %352 = vmatpush.bf16.msra.mxu1 %v166_v24  ;;  %v669_v12 = vld [vmem:[#allocation7 + $0xd8] sm:$0xff]  ;;  %v679_v13 = vpack.c.bf16 %v653_v9, %v652_v8  ;;  %v651_v16 = vld [vmem:[#allocation7 + $0x48] sm:$0xff]  ;;  %v666_v17 = vld [vmem:[#allocation7 + $0xc0] sm:$0xff] }
  0x23   :  { %v687_v14 = vpack.c.bf16 %v669_v12, %v668_v11  ;;  %v667_v18 = vld [vmem:[#allocation7 + $0xc8] sm:$0xff]  ;;  %v678_v19 = vpack.c.bf16 %v651_v16, %v650_v15  ;;  %v88_v21 = vld [vmem:[#allocation3 + $0x60] sm:$0xff]  ;;  %v648_v24 = vld [vmem:[#allocation7 + $0x30] sm:$0xff] }
  0x24   :  { %695 = vmatpush.bf16.msra.mxu2 %v680_v6  ;;  %v686_v20 = vpack.c.bf16 %v667_v18, %v666_v17  ;;  %v89_v22 = vld [vmem:[#allocation3 + $0x68] sm:$0xff]  ;;  %v649_v25 = vld [vmem:[#allocation7 + $0x38] sm:$0xff]  ;;  %v664_v26 = vld [vmem:[#allocation7 + $0xb0] sm:$0xff] }
  0x25   :  { %249 = vmatpush.bf16.msra.mxu0 %v163_v29  ;;  %799 = vmatpush.bf16.msra.mxu3 %v688_v10  ;;  %v120_v23 = vpack.c.bf16 %v89_v22, %v88_v21  ;;  %v677_v27 = vpack.c.bf16 %v649_v25, %v648_v24  ;;  %v665_v28 = vld [vmem:[#allocation7 + $0xb8] sm:$0xff]  ;;  %v647_v31 = vld [vmem:[#allocation7 + $0x28] sm:$0xff]  ;;  %v662_v32 = vld [vmem:[#allocation7 + $0xa0] sm:$0xff] }
  0x26   :  { %353 = vmatpush.bf16.msra.mxu1 %v164_v30  ;;  %v685_v29 = vpack.c.bf16 %v665_v28, %v664_v26  ;;  %v646_v30 = vld [vmem:[#allocation7 + $0x20] sm:$0xff]  ;;  %v663_v34 = vld [vmem:[#allocation7 + $0xa8] sm:$0xff]  ;;  %v645_v37 = vld [vmem:[#allocation7 + $0x18] sm:$0xff] }
  0x27   :  { %v676_v33 = vpack.c.bf16 %v647_v31, %v646_v30  ;;  %v660_v38 = vld [vmem:[#allocation7 + $0x90] sm:$0xff]  ;;  %v661_v40 = vld [vmem:[#allocation7 + $0x98] sm:$0xff]  ;;  %v643_v43 = vld [vmem:[#allocation7 + $0x8] sm:$0xff] }
  0x28   :  { %696 = vmatpush.bf16.msra.mxu2 %v679_v13  ;;  %v658_v44 = vld [vmem:[#allocation7 + $0x80] sm:$0xff]  ;;  %v91_v46 = vld [vmem:[#allocation3 + $0x78] sm:$0xff]  ;;  %v93_v52 = vld [vmem:[#allocation3 + $0x88] sm:$0xff] }
  0x29   :  { %250 = vmatpush.bf16.msra.mxu0 %v161_v35  ;;  %800 = vmatpush.bf16.msra.mxu3 %v687_v14  ;;  %v684_v35 = vpack.c.bf16 %v663_v34, %v662_v32  ;;  %v173_v53 = vld [vmem:[%s3268_s2] sm:$0x3]  ;;  %v94_v5 = vld [vmem:[#allocation3 + $0x90] sm:$0xff] }
  0x2a   :  { %354 = vmatpush.bf16.msra.mxu1 %v162_v36  ;;  %v644_v36 = vld [vmem:[#allocation7 + $0x10] sm:$0xff]  ;;  %v2417_v58 = vperm.slane %v173_v53, 1  ;;  %v95_v6 = vld [vmem:[#allocation3 + $0x98] sm:$0xff]  ;;  %v96_v26 = vld [vmem:[#allocation3 + $0xa0] sm:$0xff] }
  0x2b   :  { %v675_v39 = vpack.c.bf16 %v645_v37, %v644_v36  ;;  %v123_v13 = vpack.c.bf16 %v95_v6, %v94_v5  ;;  %v100_v6 = vld [vmem:[#allocation3 + $0xc0] sm:$0xff] }
  0x2c   :  { %697 = vmatpush.bf16.msra.mxu2 %v678_v19 }
  0x2d   :  { %251 = vmatpush.bf16.msra.mxu0 %v159_v41  ;;  %801 = vmatpush.bf16.msra.mxu3 %v686_v20  ;;  %v683_v41 = vpack.c.bf16 %v661_v40, %v660_v38 }
  0x2e   :  { %355 = vmatpush.bf16.msra.mxu1 %v160_v42  ;;  %v642_v42 = vld [vmem:[#allocation7] sm:$0xff] }
  0x2f   :  { %v674_v47 = vpack.c.bf16 %v643_v43, %v642_v42 }
  0x30   :  { %2057 = vmatmul.msk.bf16.vlgmr.msra.gmra.mxu0 %vm179_vm1, %v114_v45  ;;  %698 = vmatpush.bf16.msra.mxu2 %v677_v27  ;;  %v97_v27 = vld [vmem:[#allocation3 + $0xa8] sm:$0xff] }
  0x31   :  { %2076 = vmatmul.msk.bf16.vlgmr.msra.gmra.mxu1 %vm179_vm1, %v114_v45  ;;  %802 = vmatpush.bf16.msra.mxu3 %v685_v29  ;;  %v90_v45 = vld [vmem:[#allocation3 + $0x70] sm:$0xff]  ;;  %v124_v34 = vpack.c.bf16 %v97_v27, %v96_v26 }
  0x32   :  { %v121_v50 = vpack.c.bf16 %v91_v46, %v90_v45  ;;  %v102_v27 = vld [vmem:[#allocation3 + $0xd0] sm:$0xff] }
  0x34   :  { %699 = vmatpush.bf16.msra.mxu2 %v676_v33 }
  0x35   :  { %803 = vmatpush.bf16.msra.mxu3 %v684_v35 }
  0x38   :  { %700 = vmatpush.bf16.msra.mxu2 %v675_v39 }
  0x39   :  { %804 = vmatpush.bf16.msra.mxu3 %v683_v41 }
  0x3c   :  { %701 = vmatpush.bf16.msra.mxu2 %v674_v47  ;;  %v98_v47 = vld [vmem:[#allocation3 + $0xb0] sm:$0xff] }
  0x40   :  { %2058 = vmatmul.msk.bf16.gmra.mxu0 %vm179_vm1, %v115_v48 }
  0x41   :  { %2077 = vmatmul.msk.bf16.gmra.mxu1 %vm179_vm1, %v115_v48  ;;  %v659_v48 = vld [vmem:[#allocation7 + $0x88] sm:$0xff] }
  0x42   :  { %v682_v49 = vpack.c.bf16 %v659_v48, %v658_v44  ;;  %v99_v48 = vld [vmem:[#allocation3 + $0xb8] sm:$0xff] }
  0x44   :  { %805 = vmatpush.bf16.msra.mxu3 %v682_v49 }
  0x50   :  { %2059 = vmatmul.msk.bf16.gmra.mxu0 %vm179_vm1, %v116_v51 }
  0x51   :  { %2078 = vmatmul.msk.bf16.gmra.mxu1 %vm179_vm1, %v116_v51  ;;  %v92_v51 = vld [vmem:[#allocation3 + $0x80] sm:$0xff] }
  0x60   :  { %2060 = vmatmul.msk.bf16.gmra.mxu0 %vm179_vm1, %v117_v54 }
  0x61   :  { %2079 = vmatmul.msk.bf16.gmra.mxu1 %vm179_vm1, %v117_v54  ;;  %v122_v54 = vpack.c.bf16 %v93_v52, %v92_v51 }
  0x70   :  { %2061 = vmatmul.msk.bf16.gmra.mxu0 %vm179_vm1, %v118_v57 }
  0x71   :  { %2080 = vmatmul.msk.bf16.gmra.mxu1 %vm179_vm1, %v118_v57  ;;  %v2415_v57 = vperm.slane %v173_v53, 0 }
  0x80   :  { %2062 = vmatmul.msk.bf16.gmra.mxu0 %vm179_vm1, %v119_v2 }
  0x81   :  { %2081 = vmatmul.msk.bf16.gmra.mxu1 %vm179_vm1, %v119_v2 }
  0x90   :  { %2063 = vmatmul.msk.bf16.gmra.mxu0 %vm179_vm1, %v120_v23 }
  0x91   :  { %2082 = vmatmul.msk.bf16.gmra.mxu1 %vm179_vm1, %v120_v23 }
  0xa0   :  { %2064 = vmatmul.msk.bf16.gmra.mxu0 %vm179_vm1, %v121_v50 }
  0xa1   :  { %2083 = vmatmul.msk.bf16.gmra.mxu1 %vm179_vm1, %v121_v50 }
  0xad   :  { %v253_v55 = vpop.f32.mrf.mxu0 }
  0xae   :  { %v357_v56 = vpop.f32.mrf.mxu1  ;;  %v254_v59 = vadd.f32 %v253_v55, %v2415_v57  ;;  %v125_v55 = vpack.c.bf16 %v99_v48, %v98_v47  ;;  %v104_v48 = vld [vmem:[#allocation3 + $0xe0] sm:$0xff] }
  0xaf   :  { %v358_v60 = vadd.f32 %v357_v56, %v2417_v58 }
  0xb0   :  { %2065 = vmatmul.msk.bf16.gmra.mxu0 %vm179_vm1, %v122_v54  ;;  %v452_v63 = vmul.f32 0.2, %v254_v59 }
  0xb1   :  { %2084 = vmatmul.msk.bf16.gmra.mxu1 %vm179_vm1, %v122_v54  ;;  %v453_v0 = vmul.f32 0.2, %v358_v60 }
  0xb2   :  { %v528_v7 = vmax.f32 %v254_v59, %v452_v63 }
  0xb3   :  { %v529_v8 = vmax.f32 %v358_v60, %v453_v0 }
  0xb5   :  { %v255_v61 = vpop.f32.mrf.mxu0 }
  0xb6   :  { %v359_v62 = vpop.f32.mrf.mxu1  ;;  %v256_v1 = vadd.f32 %v255_v61, %v2415_v57 }
  0xb7   :  { %v360_v2 = vadd.f32 %v359_v62, %v2417_v58 }
  0xb8   :  { %v454_v3 = vmul.f32 0.2, %v256_v1 }
  0xb9   :  { %v455_v4 = vmul.f32 0.2, %v360_v2 }
  0xba   :  { %v530_v9 = vmax.f32 %v256_v1, %v454_v3 }
  0xbb   :  { %v531_v10 = vmax.f32 %v360_v2, %v455_v4 }
  0xbc   :  { %v604_v11 = vpack.c.bf16 %v530_v9, %v528_v7  ;;  %v101_v7 = vld [vmem:[#allocation3 + $0xc8] sm:$0xff] }
  0xbd   :  { %v605_v12 = vpack.c.bf16 %v531_v10, %v529_v8  ;;  %v258_v14 = vpop.f32.mrf.mxu0 }
  0xbe   :  { %v362_v15 = vpop.f32.mrf.mxu1  ;;  %702 = vmatmul.bf16.vlgmr.msra.gmra.mxu2 %v604_v11  ;;  %v259_v16 = vadd.f32 %v258_v14, %v2415_v57  ;;  %v126_v14 = vpack.c.bf16 %v101_v7, %v100_v6  ;;  %v106_v7 = vld [vmem:[#allocation3 + $0xf0] sm:$0xff] }
  0xbf   :  { %806 = vmatmul.bf16.vlgmr.msra.gmra.mxu3 %v605_v12  ;;  %v363_v17 = vadd.f32 %v362_v15, %v2417_v58 }
  0xc0   :  { %2066 = vmatmul.msk.bf16.gmra.mxu0 %vm179_vm1, %v123_v13  ;;  %v456_v20 = vmul.f32 0.2, %v259_v16 }
  0xc1   :  { %2085 = vmatmul.msk.bf16.gmra.mxu1 %vm179_vm1, %v123_v13  ;;  %v457_v21 = vmul.f32 0.2, %v363_v17 }
  0xc2   :  { %v532_v28 = vmax.f32 %v259_v16, %v456_v20 }
  0xc3   :  { %v533_v29 = vmax.f32 %v363_v17, %v457_v21 }
  0xc5   :  { %v260_v18 = vpop.f32.mrf.mxu0 }
  0xc6   :  { %v364_v19 = vpop.f32.mrf.mxu1  ;;  %v261_v22 = vadd.f32 %v260_v18, %v2415_v57 }
  0xc7   :  { %v365_v23 = vadd.f32 %v364_v19, %v2417_v58 }
  0xc8   :  { %v458_v24 = vmul.f32 0.2, %v261_v22 }
  0xc9   :  { %v459_v25 = vmul.f32 0.2, %v365_v23 }
  0xca   :  { %v534_v30 = vmax.f32 %v261_v22, %v458_v24 }
  0xcb   :  { %v535_v31 = vmax.f32 %v365_v23, %v459_v25 }
  0xcc   :  { %v606_v32 = vpack.c.bf16 %v534_v30, %v532_v28  ;;  %v103_v28 = vld [vmem:[#allocation3 + $0xd8] sm:$0xff] }
  0xcd   :  { %v607_v33 = vpack.c.bf16 %v535_v31, %v533_v29  ;;  %v263_v35 = vpop.f32.mrf.mxu0 }
  0xce   :  { %v367_v36 = vpop.f32.mrf.mxu1  ;;  %707 = vmatmul.bf16.gmra.mxu2 %v606_v32  ;;  %v264_v37 = vadd.f32 %v263_v35, %v2415_v57  ;;  %v127_v35 = vpack.c.bf16 %v103_v28, %v102_v27  ;;  %v108_v28 = vld [vmem:[#allocation3 + $0x100] sm:$0xff] }
  0xcf   :  { %811 = vmatmul.bf16.gmra.mxu3 %v607_v33  ;;  %v368_v38 = vadd.f32 %v367_v36, %v2417_v58 }
  0xd0   :  { %2067 = vmatmul.msk.bf16.gmra.mxu0 %vm179_vm1, %v124_v34  ;;  %v460_v41 = vmul.f32 0.2, %v264_v37 }
  0xd1   :  { %2086 = vmatmul.msk.bf16.gmra.mxu1 %vm179_vm1, %v124_v34  ;;  %v461_v42 = vmul.f32 0.2, %v368_v38 }
  0xd2   :  { %v536_v49 = vmax.f32 %v264_v37, %v460_v41 }
  0xd3   :  { %v537_v50 = vmax.f32 %v368_v38, %v461_v42 }
  0xd5   :  { %v265_v39 = vpop.f32.mrf.mxu0 }
  0xd6   :  { %v369_v40 = vpop.f32.mrf.mxu1  ;;  %v266_v43 = vadd.f32 %v265_v39, %v2415_v57 }
  0xd7   :  { %v370_v44 = vadd.f32 %v369_v40, %v2417_v58 }
  0xd8   :  { %v462_v45 = vmul.f32 0.2, %v266_v43 }
  0xd9   :  { %v463_v46 = vmul.f32 0.2, %v370_v44 }
  0xda   :  { %v538_v51 = vmax.f32 %v266_v43, %v462_v45 }
  0xdb   :  { %v539_v52 = vmax.f32 %v370_v44, %v463_v46 }
  0xdc   :  { %v608_v53 = vpack.c.bf16 %v538_v51, %v536_v49  ;;  %v105_v49 = vld [vmem:[#allocation3 + $0xe8] sm:$0xff] }
  0xdd   :  { %v609_v54 = vpack.c.bf16 %v539_v52, %v537_v50  ;;  %v268_v56 = vpop.f32.mrf.mxu0 }
  0xde   :  { %v372_v59 = vpop.f32.mrf.mxu1  ;;  %712 = vmatmul.bf16.gmra.mxu2 %v608_v53  ;;  %v269_v60 = vadd.f32 %v268_v56, %v2415_v57  ;;  %v128_v56 = vpack.c.bf16 %v105_v49, %v104_v48  ;;  %v110_v49 = vld [vmem:[#allocation3 + $0x110] sm:$0xff] }
  0xdf   :  { %816 = vmatmul.bf16.gmra.mxu3 %v609_v54  ;;  %v373_v61 = vadd.f32 %v372_v59, %v2417_v58 }
  0xe0   :  { %2068 = vmatmul.msk.bf16.gmra.mxu0 %vm179_vm1, %v125_v55  ;;  %v464_v0 = vmul.f32 0.2, %v269_v60 }
  0xe1   :  { %2087 = vmatmul.msk.bf16.gmra.mxu1 %vm179_vm1, %v125_v55  ;;  %v465_v1 = vmul.f32 0.2, %v373_v61 }
  0xe2   :  { %v540_v8 = vmax.f32 %v269_v60, %v464_v0 }
  0xe3   :  { %v541_v9 = vmax.f32 %v373_v61, %v465_v1 }
  0xe5   :  { %v270_v62 = vpop.f32.mrf.mxu0 }
  0xe6   :  { %v374_v63 = vpop.f32.mrf.mxu1  ;;  %v271_v2 = vadd.f32 %v270_v62, %v2415_v57 }
  0xe7   :  { %v375_v3 = vadd.f32 %v374_v63, %v2417_v58 }
  0xe8   :  { %v466_v4 = vmul.f32 0.2, %v271_v2 }
  0xe9   :  { %v467_v5 = vmul.f32 0.2, %v375_v3 }
  0xea   :  { %v542_v10 = vmax.f32 %v271_v2, %v466_v4 }
  0xeb   :  { %v543_v11 = vmax.f32 %v375_v3, %v467_v5 }
  0xec   :  { %v610_v12 = vpack.c.bf16 %v542_v10, %v540_v8  ;;  %v107_v8 = vld [vmem:[#allocation3 + $0xf8] sm:$0xff] }
  0xed   :  { %v611_v13 = vpack.c.bf16 %v543_v11, %v541_v9  ;;  %v273_v15 = vpop.f32.mrf.mxu0 }
  0xee   :  { %v377_v16 = vpop.f32.mrf.mxu1  ;;  %717 = vmatmul.bf16.gmra.mxu2 %v610_v12  ;;  %v274_v17 = vadd.f32 %v273_v15, %v2415_v57  ;;  %v129_v15 = vpack.c.bf16 %v107_v8, %v106_v7 }
  0xef   :  { %821 = vmatmul.bf16.gmra.mxu3 %v611_v13  ;;  %v378_v18 = vadd.f32 %v377_v16, %v2417_v58 }
  0xf0   :  { %2069 = vmatmul.msk.bf16.gmra.mxu0 %vm179_vm1, %v126_v14  ;;  %v468_v21 = vmul.f32 0.2, %v274_v17 }
  0xf1   :  { %2088 = vmatmul.msk.bf16.gmra.mxu1 %vm179_vm1, %v126_v14  ;;  %v469_v22 = vmul.f32 0.2, %v378_v18 }
  0xf2   :  { %v544_v29 = vmax.f32 %v274_v17, %v468_v21 }
  0xf3   :  { %v545_v30 = vmax.f32 %v378_v18, %v469_v22 }
  0xf5   :  { %v275_v19 = vpop.f32.mrf.mxu0 }
  0xf6   :  { %v379_v20 = vpop.f32.mrf.mxu1  ;;  %v276_v23 = vadd.f32 %v275_v19, %v2415_v57 }
  0xf7   :  { %v380_v24 = vadd.f32 %v379_v20, %v2417_v58 }
  0xf8   :  { %v470_v25 = vmul.f32 0.2, %v276_v23 }
  0xf9   :  { %v471_v26 = vmul.f32 0.2, %v380_v24 }
  0xfa   :  { %v546_v31 = vmax.f32 %v276_v23, %v470_v25 }
  0xfb   :  { %v547_v32 = vmax.f32 %v380_v24, %v471_v26 }
  0xfc   :  { %v612_v33 = vpack.c.bf16 %v546_v31, %v544_v29  ;;  %v109_v29 = vld [vmem:[#allocation3 + $0x108] sm:$0xff] }
  0xfd   :  { %v613_v34 = vpack.c.bf16 %v547_v32, %v545_v30  ;;  %v278_v36 = vpop.f32.mrf.mxu0 }
  0xfe   :  { %v382_v37 = vpop.f32.mrf.mxu1  ;;  %722 = vmatmul.bf16.gmra.mxu2 %v612_v33  ;;  %v279_v38 = vadd.f32 %v278_v36, %v2415_v57  ;;  %v130_v36 = vpack.c.bf16 %v109_v29, %v108_v28 }
  0xff   :  { %826 = vmatmul.bf16.gmra.mxu3 %v613_v34  ;;  %v383_v39 = vadd.f32 %v382_v37, %v2417_v58 }
 0x100   :  { %2070 = vmatmul.msk.bf16.gmra.mxu0 %vm179_vm1, %v127_v35  ;;  %v472_v42 = vmul.f32 0.2, %v279_v38 }
 0x101   :  { %2089 = vmatmul.msk.bf16.gmra.mxu1 %vm179_vm1, %v127_v35  ;;  %v473_v43 = vmul.f32 0.2, %v383_v39 }
 0x102   :  { %v548_v50 = vmax.f32 %v279_v38, %v472_v42 }
 0x103   :  { %v549_v51 = vmax.f32 %v383_v39, %v473_v43 }
 0x105   :  { %v280_v40 = vpop.f32.mrf.mxu0 }
 0x106   :  { %v384_v41 = vpop.f32.mrf.mxu1  ;;  %v281_v44 = vadd.f32 %v280_v40, %v2415_v57 }
 0x107   :  { %v385_v45 = vadd.f32 %v384_v41, %v2417_v58 }
 0x108   :  { %v474_v46 = vmul.f32 0.2, %v281_v44 }
 0x109   :  { %v475_v47 = vmul.f32 0.2, %v385_v45 }
 0x10a   :  { %v550_v52 = vmax.f32 %v281_v44, %v474_v46 }
 0x10b   :  { %v551_v53 = vmax.f32 %v385_v45, %v475_v47 }
 0x10c   :  { %v614_v54 = vpack.c.bf16 %v550_v52, %v548_v50  ;;  %v111_v50 = vld [vmem:[#allocation3 + $0x118] sm:$0xff] }
 0x10d   :  { %v615_v55 = vpack.c.bf16 %v551_v53, %v549_v51  ;;  %v283_v59 = vpop.f32.mrf.mxu0 }
 0x10e   :  { %v387_v60 = vpop.f32.mrf.mxu1  ;;  %727 = vmatmul.bf16.gmra.mxu2 %v614_v54  ;;  %v284_v61 = vadd.f32 %v283_v59, %v2415_v57  ;;  %v131_v59 = vpack.c.bf16 %v111_v50, %v110_v49 }
 0x10f   :  { %831 = vmatmul.bf16.gmra.mxu3 %v615_v55  ;;  %v388_v62 = vadd.f32 %v387_v60, %v2417_v58 }
 0x110   :  { %2071 = vmatmul.msk.bf16.gmra.mxu0 %vm179_vm1, %v128_v56  ;;  %v476_v1 = vmul.f32 0.2, %v284_v61 }
 0x111   :  { %2090 = vmatmul.msk.bf16.gmra.mxu1 %vm179_vm1, %v128_v56  ;;  %v477_v2 = vmul.f32 0.2, %v388_v62 }
 0x112   :  { %v552_v9 = vmax.f32 %v284_v61, %v476_v1 }
 0x113   :  { %v553_v10 = vmax.f32 %v388_v62, %v477_v2  ;;  %v2476_v62 = vld [vmem:[%s3270_s4] ss:$0 sm:$0xff] }
 0x115   :  { %v285_v63 = vpop.f32.mrf.mxu0 }
 0x116   :  { %v389_v0 = vpop.f32.mrf.mxu1  ;;  %v286_v3 = vadd.f32 %v285_v63, %v2415_v57 }
 0x117   :  { %v390_v4 = vadd.f32 %v389_v0, %v2417_v58 }
 0x118   :  { %v478_v5 = vmul.f32 0.2, %v286_v3 }
 0x119   :  { %v479_v6 = vmul.f32 0.2, %v390_v4 }
 0x11a   :  { %v554_v11 = vmax.f32 %v286_v3, %v478_v5 }
 0x11b   :  { %v555_v12 = vmax.f32 %v390_v4, %v479_v6 }
 0x11c   :  { %v616_v13 = vpack.c.bf16 %v554_v11, %v552_v9 }
 0x11d   :  { %v617_v14 = vpack.c.bf16 %v555_v12, %v553_v10  ;;  %v288_v16 = vpop.f32.mrf.mxu0  ;;  %v2488_v12 = vld [vmem:[%s3271_s5] ss:$0 sm:$0xff] }
 0x11e   :  { %v392_v17 = vpop.f32.mrf.mxu1  ;;  %732 = vmatmul.bf16.gmra.mxu2 %v616_v13  ;;  %v289_v18 = vadd.f32 %v288_v16, %v2415_v57 }
 0x11f   :  { %836 = vmatmul.bf16.gmra.mxu3 %v617_v14  ;;  %v393_v19 = vadd.f32 %v392_v17, %v2417_v58 }
 0x120   :  { %2072 = vmatmul.msk.bf16.gmra.mxu0 %vm179_vm1, %v129_v15  ;;  %v480_v22 = vmul.f32 0.2, %v289_v18 }
 0x121   :  { %2091 = vmatmul.msk.bf16.gmra.mxu1 %vm179_vm1, %v129_v15  ;;  %v481_v23 = vmul.f32 0.2, %v393_v19 }
 0x122   :  { %v556_v30 = vmax.f32 %v289_v18, %v480_v22 }
 0x123   :  { %v557_v31 = vmax.f32 %v393_v19, %v481_v23 }
 0x125   :  { %v290_v20 = vpop.f32.mrf.mxu0 }
 0x126   :  { %v394_v21 = vpop.f32.mrf.mxu1  ;;  %v291_v24 = vadd.f32 %v290_v20, %v2415_v57  ;;  %v112_v20 = vld [vmem:[#allocation3 + $0x120] sm:$0xff] }
 0x127   :  { %v395_v25 = vadd.f32 %v394_v21, %v2417_v58  ;;  %v113_v21 = vld [vmem:[#allocation3 + $0x128] sm:$0xff] }
 0x128   :  { %v482_v26 = vmul.f32 0.2, %v291_v24  ;;  %v132_v29 = vpack.c.bf16 %v113_v21, %v112_v20 }
 0x129   :  { %v483_v27 = vmul.f32 0.2, %v395_v25 }
 0x12a   :  { %v558_v32 = vmax.f32 %v291_v24, %v482_v26 }
 0x12b   :  { %v559_v33 = vmax.f32 %v395_v25, %v483_v27 }
 0x12c   :  { %v618_v34 = vpack.c.bf16 %v558_v32, %v556_v30 }
 0x12d   :  { %v619_v35 = vpack.c.bf16 %v559_v33, %v557_v31  ;;  %v293_v37 = vpop.f32.mrf.mxu0 }
 0x12e   :  { %v397_v38 = vpop.f32.mrf.mxu1  ;;  %737 = vmatmul.bf16.gmra.mxu2 %v618_v34  ;;  %v294_v39 = vadd.f32 %v293_v37, %v2415_v57 }
 0x12f   :  { %841 = vmatmul.bf16.gmra.mxu3 %v619_v35  ;;  %v398_v40 = vadd.f32 %v397_v38, %v2417_v58 }
 0x130   :  { %2073 = vmatmul.msk.bf16.gmra.mxu0 %vm179_vm1, %v130_v36  ;;  %v484_v43 = vmul.f32 0.2, %v294_v39 }
 0x131   :  { %2092 = vmatmul.msk.bf16.gmra.mxu1 %vm179_vm1, %v130_v36  ;;  %v485_v44 = vmul.f32 0.2, %v398_v40 }
 0x132   :  { %v560_v51 = vmax.f32 %v294_v39, %v484_v43 }
 0x133   :  { %v561_v52 = vmax.f32 %v398_v40, %v485_v44 }
 0x135   :  { %v295_v41 = vpop.f32.mrf.mxu0 }
 0x136   :  { %v399_v42 = vpop.f32.mrf.mxu1  ;;  %v296_v45 = vadd.f32 %v295_v41, %v2415_v57 }
 0x137   :  { %v400_v46 = vadd.f32 %v399_v42, %v2417_v58 }
 0x138   :  { %v486_v47 = vmul.f32 0.2, %v296_v45 }
 0x139   :  { %v487_v48 = vmul.f32 0.2, %v400_v46 }
 0x13a   :  { %v562_v53 = vmax.f32 %v296_v45, %v486_v47 }
 0x13b   :  { %v563_v54 = vmax.f32 %v400_v46, %v487_v48 }
 0x13c   :  { %v620_v55 = vpack.c.bf16 %v562_v53, %v560_v51 }
 0x13d   :  { %v621_v56 = vpack.c.bf16 %v563_v54, %v561_v52  ;;  %v298_v60 = vpop.f32.mrf.mxu0 }
 0x13e   :  { %v402_v61 = vpop.f32.mrf.mxu1  ;;  %742 = vmatmul.bf16.gmra.mxu2 %v620_v55  ;;  %v299_v63 = vadd.f32 %v298_v60, %v2415_v57 }
 0x13f   :  { %846 = vmatmul.bf16.gmra.mxu3 %v621_v56  ;;  %v403_v0 = vadd.f32 %v402_v61, %v2417_v58 }
 0x140   :  { %2074 = vmatmul.msk.bf16.gmra.mxu0 %vm179_vm1, %v131_v59  ;;  %v488_v5 = vmul.f32 0.2, %v299_v63 }
 0x141   :  { %2093 = vmatmul.msk.bf16.gmra.mxu1 %vm179_vm1, %v131_v59  ;;  %v703_v1 = vpop.f32.mrf.mxu2  ;;  %v489_v6 = vmul.f32 0.2, %v403_v0 }
 0x142   :  { %v807_v2 = vpop.f32.mrf.mxu3  ;;  %v704_v3 = vadd.f32 %v2476_v62, %v703_v1  ;;  %v564_v16 = vmax.f32 %v299_v63, %v488_v5 }
 0x143   :  { %v565_v17 = vmax.f32 %v403_v0, %v489_v6 }
 0x144   :  { %v808_v4 = vadd.f32 %v807_v2, %v704_v3 }
 0x145   :  { %v300_v7 = vpop.f32.mrf.mxu0 }
 0x146   :  { %v404_v8 = vpop.f32.mrf.mxu1  ;;  %v902_v9 = vmul.f32 0.2, %v808_v4  ;;  %v301_v10 = vadd.f32 %v300_v7, %v2415_v57 }
 0x147   :  { %v405_v11 = vadd.f32 %v404_v8, %v2417_v58 }
 0x148   :  { %v490_v13 = vmul.f32 0.2, %v301_v10  ;;  %v940_v15 = vmax.f32 %v808_v4, %v902_v9 }
 0x149   :  { %v491_v14 = vmul.f32 0.2, %v405_v11  ;;  %v705_v18 = vpop.f32.mrf.mxu2 }
 0x14a   :  { %v809_v19 = vpop.f32.mrf.mxu3  ;;  %v566_v22 = vmax.f32 %v301_v10, %v490_v13  ;;  %v706_v24 = vadd.f32 %v2476_v62, %v705_v18  ;;  %v982_v25 = vmul.f32 %v2488_v12, %v940_v15 }
 0x14b   :  { %v567_v23 = vmax.f32 %v405_v11, %v491_v14 }
 0x14c   :  { %v810_v26 = vadd.f32 %v809_v19, %v706_v24  ;;  %1020 = vadd.xlane.f32.xlu0 %v982_v25  ;;  %v622_v27 = vpack.c.bf16 %v566_v22, %v564_v16 }
 0x14d   :  { %v623_v28 = vpack.c.bf16 %v567_v23, %v565_v17  ;;  %v303_v30 = vpop.f32.mrf.mxu0 }
 0x14e   :  { %v407_v31 = vpop.f32.mrf.mxu1  ;;  %v903_v32 = vmul.f32 0.2, %v810_v26  ;;  %747 = vmatmul.bf16.gmra.mxu2 %v622_v27  ;;  %v304_v34 = vadd.f32 %v303_v30, %v2415_v57 }
 0x14f   :  { %851 = vmatmul.bf16.gmra.mxu3 %v623_v28  ;;  %v408_v35 = vadd.f32 %v407_v31, %v2417_v58 }
 0x150   :  { %2075 = vmatmul.msk.bf16.gmra.mxu0 %vm179_vm1, %v132_v29  ;;  %v941_v33 = vmax.f32 %v810_v26, %v903_v32  ;;  %v492_v41 = vmul.f32 0.2, %v304_v34 }
 0x151   :  { %2094 = vmatmul.msk.bf16.gmra.mxu1 %vm179_vm1, %v132_v29  ;;  %v708_v36 = vpop.f32.mrf.mxu2  ;;  %v493_v42 = vmul.f32 0.2, %v408_v35 }
 0x152   :  { %v812_v37 = vpop.f32.mrf.mxu3  ;;  %v709_v38 = vadd.f32 %v2476_v62, %v708_v36  ;;  %v983_v39 = vmul.f32 %v2488_v12, %v941_v33  ;;  %v568_v51 = vmax.f32 %v304_v34, %v492_v41 }
 0x153   :  { %v569_v52 = vmax.f32 %v408_v35, %v493_v42 }
 0x154   :  { %v813_v40 = vadd.f32 %v812_v37, %v709_v38  ;;  %1022 = vadd.xlane.f32.xlu0 %v983_v39 }
 0x155   :  { %v305_v43 = vpop.f32.mrf.mxu0 }
 0x156   :  { %v409_v44 = vpop.f32.mrf.mxu1  ;;  %v904_v45 = vmul.f32 0.2, %v813_v40  ;;  %v306_v46 = vadd.f32 %v305_v43, %v2415_v57 }
 0x157   :  { %v410_v47 = vadd.f32 %v409_v44, %v2417_v58 }
 0x158   :  { %v494_v48 = vmul.f32 0.2, %v306_v46  ;;  %v942_v50 = vmax.f32 %v813_v40, %v904_v45 }
 0x159   :  { %v495_v49 = vmul.f32 0.2, %v410_v47  ;;  %v710_v53 = vpop.f32.mrf.mxu2 }
 0x15a   :  { %v814_v54 = vpop.f32.mrf.mxu3  ;;  %v570_v55 = vmax.f32 %v306_v46, %v494_v48  ;;  %v711_v59 = vadd.f32 %v2476_v62, %v710_v53  ;;  %v984_v60 = vmul.f32 %v2488_v12, %v942_v50 }
 0x15b   :  { %v571_v56 = vmax.f32 %v410_v47, %v495_v49 }
 0x15c   :  { %v815_v61 = vadd.f32 %v814_v54, %v711_v59  ;;  %1024 = vadd.xlane.f32.xlu1 %v984_v60  ;;  %v624_v63 = vpack.c.bf16 %v570_v55, %v568_v51 }
 0x15d   :  { %v625_v0 = vpack.c.bf16 %v571_v56, %v569_v52  ;;  %v308_v1 = vpop.f32.mrf.mxu0 }
 0x15e   :  { %v412_v2 = vpop.f32.mrf.mxu1  ;;  %v905_v3 = vmul.f32 0.2, %v815_v61  ;;  %752 = vmatmul.bf16.gmra.mxu2 %v624_v63  ;;  %v309_v5 = vadd.f32 %v308_v1, %v2415_v57 }
 0x15f   :  { %856 = vmatmul.bf16.gmra.mxu3 %v625_v0  ;;  %v413_v6 = vadd.f32 %v412_v2, %v2417_v58 }
 0x160   :  { %v943_v4 = vmax.f32 %v815_v61, %v905_v3  ;;  %v496_v13 = vmul.f32 0.2, %v309_v5 }
 0x161   :  { %v713_v7 = vpop.f32.mrf.mxu2  ;;  %v497_v14 = vmul.f32 0.2, %v413_v6 }
 0x162   :  { %v817_v8 = vpop.f32.mrf.mxu3  ;;  %v714_v9 = vadd.f32 %v2476_v62, %v713_v7  ;;  %v985_v10 = vmul.f32 %v2488_v12, %v943_v4  ;;  %v572_v23 = vmax.f32 %v309_v5, %v496_v13 }
 0x163   :  { %v573_v24 = vmax.f32 %v413_v6, %v497_v14 }
 0x164   :  { %v818_v11 = vadd.f32 %v817_v8, %v714_v9  ;;  %1026 = vadd.xlane.f32.xlu1 %v985_v10 }
 0x165   :  { %v310_v15 = vpop.f32.mrf.mxu0 }
 0x166   :  { %v414_v16 = vpop.f32.mrf.mxu1  ;;  %v906_v17 = vmul.f32 0.2, %v818_v11  ;;  %v311_v18 = vadd.f32 %v310_v15, %v2415_v57 }
 0x167   :  { %v415_v19 = vadd.f32 %v414_v16, %v2417_v58 }
 0x168   :  { %v498_v20 = vmul.f32 0.2, %v311_v18  ;;  %v944_v22 = vmax.f32 %v818_v11, %v906_v17 }
 0x169   :  { %v499_v21 = vmul.f32 0.2, %v415_v19  ;;  %v715_v25 = vpop.f32.mrf.mxu2 }
 0x16a   :  { %v819_v26 = vpop.f32.mrf.mxu3  ;;  %v574_v27 = vmax.f32 %v311_v18, %v498_v20  ;;  %v716_v29 = vadd.f32 %v2476_v62, %v715_v25  ;;  %v986_v30 = vmul.f32 %v2488_v12, %v944_v22 }
 0x16b   :  { %v575_v28 = vmax.f32 %v415_v19, %v499_v21 }
 0x16c   :  { %v820_v31 = vadd.f32 %v819_v26, %v716_v29  ;;  %1028 = vadd.xlane.f32.xlu2 %v986_v30  ;;  %v626_v32 = vpack.c.bf16 %v574_v27, %v572_v23 }
 0x16d   :  { %v627_v33 = vpack.c.bf16 %v575_v28, %v573_v24  ;;  %v313_v34 = vpop.f32.mrf.mxu0 }
 0x16e   :  { %v417_v35 = vpop.f32.mrf.mxu1  ;;  %v907_v36 = vmul.f32 0.2, %v820_v31  ;;  %757 = vmatmul.bf16.gmra.mxu2 %v626_v32  ;;  %v314_v38 = vadd.f32 %v313_v34, %v2415_v57 }
 0x16f   :  { %861 = vmatmul.bf16.gmra.mxu3 %v627_v33  ;;  %v418_v39 = vadd.f32 %v417_v35, %v2417_v58 }
 0x170   :  { %v945_v37 = vmax.f32 %v820_v31, %v907_v36  ;;  %v500_v45 = vmul.f32 0.2, %v314_v38 }
 0x171   :  { %v718_v40 = vpop.f32.mrf.mxu2  ;;  %v501_v46 = vmul.f32 0.2, %v418_v39 }
 0x172   :  { %v822_v41 = vpop.f32.mrf.mxu3  ;;  %v719_v42 = vadd.f32 %v2476_v62, %v718_v40  ;;  %v987_v43 = vmul.f32 %v2488_v12, %v945_v37  ;;  %v576_v55 = vmax.f32 %v314_v38, %v500_v45 }
 0x173   :  { %v577_v56 = vmax.f32 %v418_v39, %v501_v46 }
 0x174   :  { %v823_v44 = vadd.f32 %v822_v41, %v719_v42  ;;  %1030 = vadd.xlane.f32.xlu2 %v987_v43 }
 0x175   :  { %v315_v47 = vpop.f32.mrf.mxu0 }
 0x176   :  { %v419_v48 = vpop.f32.mrf.mxu1  ;;  %v908_v49 = vmul.f32 0.2, %v823_v44  ;;  %v316_v50 = vadd.f32 %v315_v47, %v2415_v57 }
 0x177   :  { %v420_v51 = vadd.f32 %v419_v48, %v2417_v58 }
 0x178   :  { %v946_v52 = vmax.f32 %v823_v44, %v908_v49  ;;  %v502_v53 = vmul.f32 0.2, %v316_v50 }
 0x179   :  { %v503_v54 = vmul.f32 0.2, %v420_v51  ;;  %v720_v59 = vpop.f32.mrf.mxu2 }
 0x17a   :  { %v824_v60 = vpop.f32.mrf.mxu3  ;;  %v578_v61 = vmax.f32 %v316_v50, %v502_v53  ;;  %v721_v0 = vadd.f32 %v2476_v62, %v720_v59  ;;  %v988_v1 = vmul.f32 %v2488_v12, %v946_v52 }
 0x17b   :  { %v579_v63 = vmax.f32 %v420_v51, %v503_v54 }
 0x17c   :  { %v825_v2 = vadd.f32 %v824_v60, %v721_v0  ;;  %1032 = vadd.xlane.f32.xlu0 %v988_v1  ;;  %v628_v3 = vpack.c.bf16 %v578_v61, %v576_v55 }
 0x17d   :  { %v629_v4 = vpack.c.bf16 %v579_v63, %v577_v56  ;;  %v318_v5 = vpop.f32.mrf.mxu0 }
 0x17e   :  { %v422_v6 = vpop.f32.mrf.mxu1  ;;  %v909_v7 = vmul.f32 0.2, %v825_v2  ;;  %762 = vmatmul.bf16.gmra.mxu2 %v628_v3  ;;  %v319_v9 = vadd.f32 %v318_v5, %v2415_v57 }
 0x17f   :  { %866 = vmatmul.bf16.gmra.mxu3 %v629_v4  ;;  %v423_v10 = vadd.f32 %v422_v6, %v2417_v58 }
 0x180   :  { %v947_v8 = vmax.f32 %v825_v2, %v909_v7  ;;  %v504_v17 = vmul.f32 0.2, %v319_v9 }
 0x181   :  { %v723_v11 = vpop.f32.mrf.mxu2  ;;  %v505_v18 = vmul.f32 0.2, %v423_v10 }
 0x182   :  { %v827_v13 = vpop.f32.mrf.mxu3  ;;  %v724_v14 = vadd.f32 %v2476_v62, %v723_v11  ;;  %v989_v15 = vmul.f32 %v2488_v12, %v947_v8  ;;  %v580_v27 = vmax.f32 %v319_v9, %v504_v17 }
 0x183   :  { %v581_v28 = vmax.f32 %v423_v10, %v505_v18 }
 0x184   :  { %v828_v16 = vadd.f32 %v827_v13, %v724_v14  ;;  %1034 = vadd.xlane.f32.xlu1 %v989_v15 }
 0x185   :  { %v320_v19 = vpop.f32.mrf.mxu0 }
 0x186   :  { %v424_v20 = vpop.f32.mrf.mxu1  ;;  %v910_v21 = vmul.f32 0.2, %v828_v16  ;;  %v321_v22 = vadd.f32 %v320_v19, %v2415_v57 }
 0x187   :  { %v425_v23 = vadd.f32 %v424_v20, %v2417_v58 }
 0x188   :  { %v948_v24 = vmax.f32 %v828_v16, %v910_v21  ;;  %v506_v25 = vmul.f32 0.2, %v321_v22 }
 0x189   :  { %v507_v26 = vmul.f32 0.2, %v425_v23  ;;  %v725_v29 = vpop.f32.mrf.mxu2 }
 0x18a   :  { %v829_v30 = vpop.f32.mrf.mxu3  ;;  %v582_v31 = vmax.f32 %v321_v22, %v506_v25  ;;  %v726_v33 = vadd.f32 %v2476_v62, %v725_v29  ;;  %v990_v34 = vmul.f32 %v2488_v12, %v948_v24 }
 0x18b   :  { %v583_v32 = vmax.f32 %v425_v23, %v507_v26 }
 0x18c   :  { %v830_v35 = vadd.f32 %v829_v30, %v726_v33  ;;  %1036 = vadd.xlane.f32.xlu2 %v990_v34  ;;  %v630_v36 = vpack.c.bf16 %v582_v31, %v580_v27 }
 0x18d   :  { %v631_v37 = vpack.c.bf16 %v583_v32, %v581_v28  ;;  %v323_v38 = vpop.f32.mrf.mxu0 }
 0x18e   :  { %v427_v39 = vpop.f32.mrf.mxu1  ;;  %v911_v40 = vmul.f32 0.2, %v830_v35  ;;  %767 = vmatmul.bf16.gmra.mxu2 %v630_v36  ;;  %v324_v42 = vadd.f32 %v323_v38, %v2415_v57 }
 0x18f   :  { %871 = vmatmul.bf16.gmra.mxu3 %v631_v37  ;;  %v428_v43 = vadd.f32 %v427_v39, %v2417_v58 }
 0x190   :  { %v949_v41 = vmax.f32 %v830_v35, %v911_v40  ;;  %v508_v49 = vmul.f32 0.2, %v324_v42 }
 0x191   :  { %v728_v44 = vpop.f32.mrf.mxu2  ;;  %v509_v50 = vmul.f32 0.2, %v428_v43 }
 0x192   :  { %v832_v45 = vpop.f32.mrf.mxu3  ;;  %v729_v46 = vadd.f32 %v2476_v62, %v728_v44  ;;  %v991_v47 = vmul.f32 %v2488_v12, %v949_v41  ;;  %v584_v61 = vmax.f32 %v324_v42, %v508_v49 }
 0x193   :  { %v585_v63 = vmax.f32 %v428_v43, %v509_v50 }
 0x194   :  { %v833_v48 = vadd.f32 %v832_v45, %v729_v46  ;;  %1038 = vadd.xlane.f32.xlu0 %v991_v47 }
 0x195   :  { %v325_v51 = vpop.f32.mrf.mxu0 }
 0x196   :  { %v429_v52 = vpop.f32.mrf.mxu1  ;;  %v912_v53 = vmul.f32 0.2, %v833_v48  ;;  %v326_v54 = vadd.f32 %v325_v51, %v2415_v57 }
 0x197   :  { %v430_v55 = vadd.f32 %v429_v52, %v2417_v58 }
 0x198   :  { %v950_v56 = vmax.f32 %v833_v48, %v912_v53  ;;  %v510_v59 = vmul.f32 0.2, %v326_v54 }
 0x199   :  { %v511_v60 = vmul.f32 0.2, %v430_v55  ;;  %v730_v0 = vpop.f32.mrf.mxu2 }
 0x19a   :  { %v834_v1 = vpop.f32.mrf.mxu3  ;;  %v586_v2 = vmax.f32 %v326_v54, %v510_v59  ;;  %v731_v4 = vadd.f32 %v2476_v62, %v730_v0  ;;  %v992_v5 = vmul.f32 %v2488_v12, %v950_v56 }
 0x19b   :  { %v587_v3 = vmax.f32 %v430_v55, %v511_v60 }
 0x19c   :  { %v835_v6 = vadd.f32 %v834_v1, %v731_v4  ;;  %1040 = vadd.xlane.f32.xlu1 %v992_v5  ;;  %v632_v7 = vpack.c.bf16 %v586_v2, %v584_v61 }
 0x19d   :  { %v633_v8 = vpack.c.bf16 %v587_v3, %v585_v63  ;;  %v328_v9 = vpop.f32.mrf.mxu0 }
 0x19e   :  { %v432_v10 = vpop.f32.mrf.mxu1  ;;  %v913_v11 = vmul.f32 0.2, %v835_v6  ;;  %772 = vmatmul.bf16.gmra.mxu2 %v632_v7  ;;  %v329_v14 = vadd.f32 %v328_v9, %v2415_v57 }
 0x19f   :  { %876 = vmatmul.bf16.gmra.mxu3 %v633_v8  ;;  %v433_v15 = vadd.f32 %v432_v10, %v2417_v58 }
 0x1a0   :  { %v951_v13 = vmax.f32 %v835_v6, %v913_v11  ;;  %v512_v21 = vmul.f32 0.2, %v329_v14 }
 0x1a1   :  { %v733_v16 = vpop.f32.mrf.mxu2  ;;  %v513_v22 = vmul.f32 0.2, %v433_v15 }
 0x1a2   :  { %v837_v17 = vpop.f32.mrf.mxu3  ;;  %v734_v18 = vadd.f32 %v2476_v62, %v733_v16  ;;  %v993_v19 = vmul.f32 %v2488_v12, %v951_v13  ;;  %v588_v31 = vmax.f32 %v329_v14, %v512_v21  ;;  %v2550_v14 = vld [vmem:[#allocation2] ss:$0 sm:$0xff] }
 0x1a3   :  { %v589_v32 = vmax.f32 %v433_v15, %v513_v22 }
 0x1a4   :  { %v838_v20 = vadd.f32 %v837_v17, %v734_v18  ;;  %1042 = vadd.xlane.f32.xlu2 %v993_v19 }
 0x1a5   :  { %v330_v23 = vpop.f32.mrf.mxu0 }
 0x1a6   :  { %v434_v24 = vpop.f32.mrf.mxu1  ;;  %v914_v25 = vmul.f32 0.2, %v838_v20  ;;  %v331_v26 = vadd.f32 %v330_v23, %v2415_v57 }
 0x1a7   :  { %v435_v27 = vadd.f32 %v434_v24, %v2417_v58 }
 0x1a8   :  { %v952_v28 = vmax.f32 %v838_v20, %v914_v25  ;;  %v514_v29 = vmul.f32 0.2, %v331_v26 }
 0x1a9   :  { %v515_v30 = vmul.f32 0.2, %v435_v27  ;;  %v735_v33 = vpop.f32.mrf.mxu2 }
 0x1aa   :  { %v839_v34 = vpop.f32.mrf.mxu3  ;;  %v590_v35 = vmax.f32 %v331_v26, %v514_v29  ;;  %v736_v37 = vadd.f32 %v2476_v62, %v735_v33  ;;  %v994_v38 = vmul.f32 %v2488_v12, %v952_v28 }
 0x1ab   :  { %v591_v36 = vmax.f32 %v435_v27, %v515_v30 }
 0x1ac   :  { %v840_v39 = vadd.f32 %v839_v34, %v736_v37  ;;  %1044 = vadd.xlane.f32.xlu0 %v994_v38  ;;  %v634_v40 = vpack.c.bf16 %v590_v35, %v588_v31 }
 0x1ad   :  { %v635_v41 = vpack.c.bf16 %v591_v36, %v589_v32  ;;  %v333_v42 = vpop.f32.mrf.mxu0 }
 0x1ae   :  { %v437_v43 = vpop.f32.mrf.mxu1  ;;  %v915_v44 = vmul.f32 0.2, %v840_v39  ;;  %777 = vmatmul.bf16.gmra.mxu2 %v634_v40  ;;  %v334_v46 = vadd.f32 %v333_v42, %v2415_v57 }
 0x1af   :  { %881 = vmatmul.bf16.gmra.mxu3 %v635_v41  ;;  %v438_v47 = vadd.f32 %v437_v43, %v2417_v58 }
 0x1b0   :  { %v953_v45 = vmax.f32 %v840_v39, %v915_v44  ;;  %v516_v53 = vmul.f32 0.2, %v334_v46 }
 0x1b1   :  { %v738_v48 = vpop.f32.mrf.mxu2  ;;  %v517_v54 = vmul.f32 0.2, %v438_v47 }
 0x1b2   :  { %v842_v49 = vpop.f32.mrf.mxu3  ;;  %v739_v50 = vadd.f32 %v2476_v62, %v738_v48  ;;  %v995_v51 = vmul.f32 %v2488_v12, %v953_v45  ;;  %v592_v2 = vmax.f32 %v334_v46, %v516_v53 }
 0x1b3   :  { %v593_v3 = vmax.f32 %v438_v47, %v517_v54 }
 0x1b4   :  { %v843_v52 = vadd.f32 %v842_v49, %v739_v50  ;;  %1046 = vadd.xlane.f32.xlu1 %v995_v51 }
 0x1b5   :  { %v335_v55 = vpop.f32.mrf.mxu0 }
 0x1b6   :  { %v439_v56 = vpop.f32.mrf.mxu1  ;;  %v916_v59 = vmul.f32 0.2, %v843_v52  ;;  %v336_v60 = vadd.f32 %v335_v55, %v2415_v57 }
 0x1b7   :  { %v440_v61 = vadd.f32 %v439_v56, %v2417_v58 }
 0x1b8   :  { %v954_v63 = vmax.f32 %v843_v52, %v916_v59  ;;  %v518_v0 = vmul.f32 0.2, %v336_v60 }
 0x1b9   :  { %v519_v1 = vmul.f32 0.2, %v440_v61  ;;  %v740_v4 = vpop.f32.mrf.mxu2 }
 0x1ba   :  { %v844_v5 = vpop.f32.mrf.mxu3  ;;  %v594_v6 = vmax.f32 %v336_v60, %v518_v0  ;;  %v741_v8 = vadd.f32 %v2476_v62, %v740_v4  ;;  %v996_v9 = vmul.f32 %v2488_v12, %v954_v63 }
 0x1bb   :  { %v595_v7 = vmax.f32 %v440_v61, %v519_v1 }
 0x1bc   :  { %v845_v10 = vadd.f32 %v844_v5, %v741_v8  ;;  %1048 = vadd.xlane.f32.xlu2 %v996_v9  ;;  %v636_v11 = vpack.c.bf16 %v594_v6, %v592_v2 }
 0x1bd   :  { %v637_v13 = vpack.c.bf16 %v595_v7, %v593_v3  ;;  %v338_v15 = vpop.f32.mrf.mxu0 }
 0x1be   :  { %v442_v16 = vpop.f32.mrf.mxu1  ;;  %v917_v17 = vmul.f32 0.2, %v845_v10  ;;  %782 = vmatmul.bf16.gmra.mxu2 %v636_v11  ;;  %v339_v21 = vadd.f32 %v338_v15, %v2415_v57 }
 0x1bf   :  { %886 = vmatmul.bf16.gmra.mxu3 %v637_v13  ;;  %v1021_v18 = vpop.xlane.xlu0 %1020  ;;  %v443_v24 = vadd.f32 %v442_v16, %v2417_v58 }
 0x1c0   :  { %v955_v19 = vmax.f32 %v845_v10, %v917_v17  ;;  %v2553_v20 = vadd.f32 %v2550_v14, %v1021_v18  ;;  %v520_v29 = vmul.f32 0.2, %v339_v21 }
 0x1c1   :  { %v743_v22 = vpop.f32.mrf.mxu2  ;;  %v521_v33 = vmul.f32 0.2, %v443_v24 }
 0x1c2   :  { %v847_v23 = vpop.f32.mrf.mxu3  ;;  %v1138_v25 = vand.u32 2147483647, %v2553_v20  ;;  %v744_v26 = vadd.f32 %v2476_v62, %v743_v22  ;;  %v997_v27 = vmul.f32 %v2488_v12, %v955_v19  ;;  %v596_v42 = vmax.f32 %v339_v21, %v520_v29 }
 0x1c3   :  { %v597_v46 = vmax.f32 %v443_v24, %v521_v33  ;;  %vm1290_vm7 = vcmp.ge.f32.partialorder %v2553_v20, 0.0 }
 0x1c4   :  { %v1176_v28 = vsub.f32 0.0, %v1138_v25  ;;  %v848_v30 = vadd.f32 %v847_v23, %v744_v26  ;;  %1050 = vadd.xlane.f32.xlu0 %v997_v27 }
 0x1c5   :  { %v340_v31 = vpop.f32.mrf.mxu0 }
 0x1c6   :  { %v444_v32 = vpop.f32.mrf.mxu1  ;;  %v1214_v34 = vmul.f32 1.442695, %v1176_v28  ;;  %v341_v35 = vadd.f32 %v340_v31, %v2415_v57  ;;  %v918_v37 = vmul.f32 0.2, %v848_v30 }
 0x1c7   :  { %v445_v36 = vadd.f32 %v444_v32, %v2417_v58  ;;  %v1023_v38 = vpop.xlane.xlu0 %1022 }
 0x1c8   :  { %2105 = vpow2.f32 %v1214_v34  ;;  %v522_v39 = vmul.f32 0.2, %v341_v35  ;;  %v2563_v41 = vadd.f32 %v2550_v14, %v1023_v38  ;;  %v956_v43 = vmax.f32 %v848_v30, %v918_v37 }
 0x1c9   :  { %v523_v40 = vmul.f32 0.2, %v445_v36  ;;  %v745_v44 = vpop.f32.mrf.mxu2 }
 0x1ca   :  { %v849_v45 = vpop.f32.mrf.mxu3  ;;  %v598_v47 = vmax.f32 %v341_v35, %v522_v39  ;;  %v1139_v49 = vand.u32 2147483647, %v2563_v41  ;;  %v746_v50 = vadd.f32 %v2476_v62, %v745_v44  ;;  %v998_v51 = vmul.f32 %v2488_v12, %v956_v43 }
 0x1cb   :  { %v599_v48 = vmax.f32 %v445_v36, %v523_v40  ;;  %vm1291_vm12 = vcmp.ge.f32.partialorder %v2563_v41, 0.0 }
 0x1cc   :  { %v1177_v52 = vsub.f32 0.0, %v1139_v49  ;;  %v638_v53 = vpack.c.bf16 %v598_v47, %v596_v42  ;;  %v850_v55 = vadd.f32 %v849_v45, %v746_v50  ;;  %1052 = vadd.xlane.f32.xlu1 %v998_v51 }
 0x1cd   :  { %v639_v54 = vpack.c.bf16 %v599_v48, %v597_v46  ;;  %v343_v56 = vpop.f32.mrf.mxu0 }
 0x1ce   :  { %v447_v59 = vpop.f32.mrf.mxu1  ;;  %v2568_v60 = vpop.eup %2105  ;;  %v1216_v61 = vmul.f32 1.442695, %v1177_v52  ;;  %787 = vmatmul.bf16.gmra.mxu2 %v638_v53  ;;  %v919_v0 = vmul.f32 0.2, %v850_v55  ;;  %v344_v3 = vadd.f32 %v343_v56, %v2415_v57 }
 0x1cf   :  { %891 = vmatmul.bf16.gmra.mxu3 %v639_v54  ;;  %v2571_v63 = vadd.f32 1.0, %v2568_v60  ;;  %v1025_v1 = vpop.xlane.xlu1 %1024  ;;  %v448_v8 = vadd.f32 %v447_v59, %v2417_v58 }
 0x1d0   :  { %2107 = vpow2.f32 %v1216_v61  ;;  %v2574_v2 = vadd.f32 %v2550_v14, %v1025_v1  ;;  %v957_v6 = vmax.f32 %v850_v55, %v919_v0  ;;  %v524_v13 = vmul.f32 0.2, %v344_v3 }
 0x1d1   :  { %2109 = vrcp.f32 %v2571_v63  ;;  %v748_v4 = vpop.f32.mrf.mxu2  ;;  %v525_v25 = vmul.f32 0.2, %v448_v8  ;;  %v1375_v30 = vand.u32 2147483647, %v2571_v63  ;;  %v1377_v31 = vand.u32 2147483648, %v2571_v63 }
 0x1d2   :  { %v852_v5 = vpop.f32.mrf.mxu3  ;;  %v1140_v7 = vand.u32 2147483647, %v2574_v2  ;;  %v749_v9 = vadd.f32 %v2476_v62, %v748_v4  ;;  %v999_v11 = vmul.f32 %v2488_v12, %v957_v6  ;;  %vm1371_vm3 = vweird.f32 %v2571_v63 }
 0x1d3   :  { %v601_v37 = vmax.f32 %v448_v8, %v525_v25  ;;  %v1378_v51 = vor.u32 1.1754944e-38, %v1377_v31  ;;  %vm1376_vm5 = vcmp.eq.f32.partialorder %v1375_v30, 8.507059e+37  ;;  %vm1292_vm1 = vcmp.ge.f32.partialorder %v2574_v2, 0.0 }
 0x1d4   :  { %v1178_v10 = vsub.f32 0.0, %v1140_v7  ;;  %v853_v15 = vadd.f32 %v852_v5, %v749_v9  ;;  %1054 = vadd.xlane.f32.xlu2 %v999_v11 }
 0x1d5   :  { %v345_v16 = vpop.f32.mrf.mxu0 }
 0x1d6   :  { %v449_v17 = vpop.f32.mrf.mxu1  ;;  %v2582_v18 = vpop.eup %2107  ;;  %v1218_v19 = vmul.f32 1.442695, %v1178_v10  ;;  %v346_v21 = vadd.f32 %v345_v16, %v2415_v57  ;;  %v920_v26 = vmul.f32 0.2, %v853_v15  ;;  %v600_v57 = vmax.f32 %v344_v3, %v524_v13 }
 0x1d7   :  { %v450_v22 = vadd.f32 %v449_v17, %v2417_v58  ;;  %v2110_v23 = vpop.eup %2109  ;;  %v2587_v24 = vadd.f32 1.0, %v2582_v18  ;;  %v1027_v29 = vpop.xlane.xlu1 %1026 }
 0x1d8   :  { %v1367_v27 = vmul.f32 %v2110_v23, %v2571_v63  ;;  %2111 = vpow2.f32 %v1218_v19  ;;  %v526_v28 = vmul.f32 0.2, %v346_v21  ;;  %v958_v34 = vmax.f32 %v853_v15, %v920_v26 }
 0x1d9   :  { %2113 = vrcp.f32 %v2587_v24  ;;  %v750_v32 = vpop.f32.mrf.mxu2  ;;  %v527_v36 = vmul.f32 0.2, %v450_v22  ;;  %vm1372_vm2 = vweird.f32 %v2110_v23  ;;  %v2594_v38 = vadd.f32 %v2550_v14, %v1027_v29 }
 0x1da   :  { %v854_v58 = vpop.f32.mrf.mxu3  ;;  %v1368_v33 = vsub.f32 1.0, %v1367_v27  ;;  %v602_v35 = vmax.f32 %v346_v21, %v526_v28  ;;  %v751_v39 = vadd.f32 %v2476_v62, %v750_v32  ;;  %v1000_v43 = vmul.f32 %v2488_v12, %v958_v34  ;;  %vm1373_vm4 = vmor %vm1371_vm3, %vm1372_vm2 }
 0x1db   :  { %v603_v42 = vmax.f32 %v450_v22, %v527_v36  ;;  %v1141_v45 = vand.u32 2147483647, %v2594_v38  ;;  %v1390_v6 = vand.u32 2147483647, %v2587_v24  ;;  %v1392_v7 = vand.u32 2147483648, %v2587_v24 }
 0x1dc   :  { %v1369_v40 = vmul.f32 %v2110_v23, %v1368_v33  ;;  %v640_v44 = vpack.c.bf16 %v602_v35, %v600_v57  ;;  %v855_v46 = vadd.f32 %v854_v58, %v751_v39  ;;  %1056 = vadd.xlane.f32.xlu0 %v1000_v43  ;;  %vm1386_vm9 = vweird.f32 %v2587_v24 }
 0x1dd   :  { %v641_v49 = vpack.c.bf16 %v603_v42, %v601_v37  ;;  %v1179_v53 = vsub.f32 0.0, %v1141_v45  ;;  %v1393_v17 = vor.u32 1.1754944e-38, %v1392_v7  ;;  %vm1391_vm11 = vcmp.eq.f32.partialorder %v1390_v6, 8.507059e+37 }
 0x1de   :  { %v2599_v47 = vpop.eup %2111  ;;  %v1370_v48 = vadd.f32 %v2110_v23, %v1369_v40  ;;  %792 = vmatmul.bf16.gmra.mxu2 %v640_v44  ;;  %v921_v54 = vmul.f32 0.2, %v855_v46 }
 0x1df   :  { %v2114_v50 = vpop.eup %2113  ;;  %v2604_v52 = vadd.f32 1.0, %v2599_v47  ;;  %v1029_v55 = vpop.xlane.xlu2 %1028  ;;  %896 = vmatmul.bf16.gmra.mxu3 %v641_v49  ;;  %v1220_v5 = vmul.f32 1.442695, %v1179_v53 }
 0x1e0   :  { %v1374_v56 = vsel %vm1373_vm4, %v2110_v23, %v1370_v48  ;;  %v1382_v59 = vmul.f32 %v2114_v50, %v2587_v24  ;;  %v2608_v61 = vadd.f32 %v2550_v14, %v1029_v55  ;;  %v959_v8 = vmax.f32 %v855_v46, %v921_v54 }
 0x1e1   :  { %v1379_v63 = vsel %vm1376_vm5, %v1378_v51, %v1374_v56  ;;  %2115 = vrcp.f32 %v2604_v52  ;;  %v753_v0 = vpop.f32.mrf.mxu2  ;;  %vm1387_vm8 = vweird.f32 %v2114_v50  ;;  %v1405_v32 = vand.u32 2147483647, %v2604_v52 }
 0x1e2   :  { %v857_v1 = vpop.f32.mrf.mxu3  ;;  %v1936_v3 = vmul.f32 %v2568_v60, %v1379_v63  ;;  %v1383_v4 = vsub.f32 1.0, %v1382_v59  ;;  %v1142_v9 = vand.u32 2147483647, %v2608_v61  ;;  %2117 = vpow2.f32 %v1220_v5  ;;  %vm1388_vm10 = vmor %vm1386_vm9, %vm1387_vm8 }
 0x1e3   :  { %v754_v60 = vadd.f32 %v2476_v62, %v753_v0  ;;  %v1001_v13 = vmul.f32 %v2488_v12, %v959_v8  ;;  %v1407_v33 = vand.u32 2147483648, %v2604_v52  ;;  %vm1401_vm14 = vweird.f32 %v2604_v52 }
 0x1e4   :  { %v1974_v10 = vsel %vm1290_vm7, %v1379_v63, %v1936_v3  ;;  %v1384_v11 = vmul.f32 %v2114_v50, %v1383_v4  ;;  %v1180_v20 = vsub.f32 0.0, %v1142_v9  ;;  %vm1406_vm0 = vcmp.eq.f32.partialorder %v1405_v32, 8.507059e+37 }
 0x1e5   :  { %2013 = vst.msk [vmem:[%s3273_s7] sm:$0xff] %vm2012_vm6, %v1974_v10  ;;  %v858_v21 = vadd.f32 %v857_v1, %v754_v60  ;;  %1058 = vadd.xlane.f32.xlu1 %v1001_v13  ;;  %v1408_v45 = vor.u32 1.1754944e-38, %v1407_v33  ;;  %vm1293_vm8 = vcmp.ge.f32.partialorder %v2594_v38, 0.0 }
 0x1e6   :  { %v1385_v15 = vadd.f32 %v2114_v50, %v1384_v11  ;;  %v1222_v19 = vmul.f32 1.442695, %v1180_v20 }
 0x1e7   :  { %v2116_v16 = vpop.eup %2115  ;;  %v1031_v22 = vpop.xlane.xlu2 %1030  ;;  %v922_v28 = vmul.f32 0.2, %v858_v21 }
 0x1e8   :  { %v1389_v23 = vsel %vm1388_vm10, %v2114_v50, %v1385_v15  ;;  %v1397_v25 = vmul.f32 %v2116_v16, %v2604_v52  ;;  %v2625_v26 = vadd.f32 %v2550_v14, %v1031_v22  ;;  %2119 = vpow2.f32 %v1222_v19  ;;  %v2628_v30 = vpop.eup %2117 }
 0x1e9   :  { %v1394_v27 = vsel %vm1391_vm11, %v1393_v17, %v1389_v23  ;;  %v755_v24 = vpop.f32.mrf.mxu2  ;;  %v2635_v34 = vadd.f32 1.0, %v2628_v30  ;;  %v960_v41 = vmax.f32 %v858_v21, %v922_v28  ;;  %vm1402_vm13 = vweird.f32 %v2116_v16  ;;  %v2683_v28 = vld [vmem:[%s3270_s4] ss:$0 sm:$0xff] }
 0x1ea   :  { %v859_v29 = vpop.f32.mrf.mxu3  ;;  %v1937_v31 = vmul.f32 %v2582_v18, %v1394_v27  ;;  %v1398_v57 = vsub.f32 1.0, %v1397_v25  ;;  %v1143_v58 = vand.u32 2147483647, %v2625_v26  ;;  %v756_v35 = vadd.f32 %v2476_v62, %v755_v24  ;;  %vm1403_vm15 = vmor %vm1401_vm14, %vm1402_vm13 }
 0x1eb   :  { %2121 = vrcp.f32 %v2635_v34  ;;  %v1002_v43 = vmul.f32 %v2488_v12, %v960_v41  ;;  %v1420_v2 = vand.u32 2147483647, %v2635_v34  ;;  %v1422_v7 = vand.u32 2147483648, %v2635_v34 }
 0x1ec   :  { %v1975_v36 = vsel %vm1291_vm12, %v1394_v27, %v1937_v31  ;;  %v1399_v37 = vmul.f32 %v2116_v16, %v1398_v57  ;;  %v1181_v39 = vsub.f32 0.0, %v1143_v58  ;;  %v860_v42 = vadd.f32 %v859_v29, %v756_v35 }
 0x1ed   :  { %2014 = vst.msk [vmem:[%s3273_s7 + $0x8] sm:$0xff] %vm2012_vm6, %v1975_v36  ;;  %1060 = vadd.xlane.f32.xlu2 %v1002_v43  ;;  %vm1416_vm3 = vweird.f32 %v2635_v34  ;;  %vm1421_vm4 = vcmp.eq.f32.partialorder %v1420_v2, 8.507059e+37  ;;  %v1423_v19 = vor.u32 1.1754944e-38, %v1422_v7  ;;  %vm1294_vm12 = vcmp.ge.f32.partialorder %v2608_v61, 0.0 }
 0x1ee   :  { %v1400_v18 = vadd.f32 %v2116_v16, %v1399_v37  ;;  %v1224_v40 = vmul.f32 1.442695, %v1181_v39  ;;  %v2645_v44 = vpop.eup %2119  ;;  %v923_v50 = vmul.f32 0.2, %v860_v42  ;;  %v2696_v37 = vld [vmem:[%s3271_s5] ss:$0 sm:$0xff] }
 0x1ef   :  { %v1033_v46 = vpop.xlane.xlu0 %1032  ;;  %v2648_v49 = vadd.f32 1.0, %v2645_v44 }
 0x1f0   :  { %v1404_v48 = vsel %vm1403_vm15, %v2116_v16, %v1400_v18  ;;  %2123 = vpow2.f32 %v1224_v40  ;;  %v2651_v52 = vadd.f32 %v2550_v14, %v1033_v46  ;;  %v961_v59 = vmax.f32 %v860_v42, %v923_v50 }
 0x1f1   :  { %v1409_v51 = vsel %vm1406_vm0, %v1408_v45, %v1404_v48  ;;  %v758_v53 = vpop.f32.mrf.mxu2  ;;  %2125 = vrcp.f32 %v2648_v49  ;;  %v2122_v56 = vpop.eup %2121  ;;  %v1435_v17 = vand.u32 2147483647, %v2648_v49  ;;  %v1437_v27 = vand.u32 2147483648, %v2648_v49 }
 0x1f2   :  { %v862_v54 = vpop.f32.mrf.mxu3  ;;  %v1938_v55 = vmul.f32 %v2599_v47, %v1409_v51  ;;  %v1144_v63 = vand.u32 2147483647, %v2651_v52  ;;  %v1412_v1 = vmul.f32 %v2122_v56, %v2635_v34  ;;  %v759_v4 = vadd.f32 %v2476_v62, %v758_v53 }
 0x1f3   :  { %v1003_v47 = vmul.f32 %v2488_v12, %v961_v59  ;;  %vm1417_vm2 = vweird.f32 %v2122_v56  ;;  %vm1431_vm9 = vweird.f32 %v2648_v49  ;;  %vm2689_vm10 = vcmp.eq.f32.partialorder %v1435_v17, 8.507059e+37 }
 0x1f4   :  { %v1976_v0 = vsel %vm1292_vm1, %v1409_v51, %v1938_v55  ;;  %v1182_v3 = vsub.f32 0.0, %v1144_v63  ;;  %v1413_v6 = vsub.f32 1.0, %v1412_v1  ;;  %v863_v10 = vadd.f32 %v862_v54, %v759_v4  ;;  %vm1418_vm5 = vmor %vm1416_vm3, %vm1417_vm2 }
 0x1f5   :  { %2015 = vst.msk [vmem:[%s3273_s7 + $0x10] sm:$0xff] %vm2012_vm6, %v1976_v0  ;;  %1062 = vadd.xlane.f32.xlu0 %v1003_v47  ;;  %v1438_v40 = vor.u32 1.1754944e-38, %v1437_v27  ;;  %vm1295_vm1 = vcmp.ge.f32.partialorder %v2625_v26, 0.0 }
 0x1f6   :  { %v2664_v5 = vpop.eup %2123  ;;  %v1226_v9 = vmul.f32 1.442695, %v1182_v3  ;;  %v1414_v60 = vmul.f32 %v2122_v56, %v1413_v6  ;;  %v924_v22 = vmul.f32 0.2, %v863_v10 }
 0x1f7   :  { %v2669_v8 = vadd.f32 1.0, %v2664_v5  ;;  %v1035_v11 = vpop.xlane.xlu1 %1034  ;;  %v2126_v20 = vpop.eup %2125 }
 0x1f8   :  { %v2672_v62 = vadd.f32 %v2550_v14, %v1035_v11  ;;  %v1427_v12 = vmul.f32 %v2126_v20, %v2648_v49  ;;  %v1415_v16 = vadd.f32 %v2122_v56, %v1414_v60  ;;  %vm1432_vm7 = vweird.f32 %v2126_v20 }
 0x1f9   :  { %2127 = vrcp.f32 %v2669_v8  ;;  %v760_v13 = vpop.f32.mrf.mxu2  ;;  %v962_v57 = vmax.f32 %v863_v10, %v924_v22  ;;  %vm1433_vm11 = vmor %vm1431_vm9, %vm1432_vm7  ;;  %v1450_v59 = vand.u32 2147483647, %v2669_v8  ;;  %v1452_v63 = vand.u32 2147483648, %v2669_v8 }
 0x1fa   :  { %v864_v15 = vpop.f32.mrf.mxu3  ;;  %2129 = vpow2.f32 %v1226_v9  ;;  %v1428_v21 = vsub.f32 1.0, %v1427_v12  ;;  %v1145_v23 = vand.u32 2147483647, %v2672_v62  ;;  %v1419_v25 = vsel %vm1418_vm5, %v2122_v56, %v1415_v16 }
 0x1fb   :  { %v761_v24 = vadd.f32 %v2683_v28, %v760_v13  ;;  %v1424_v29 = vsel %vm1421_vm4, %v1423_v19, %v1419_v25  ;;  %v1004_v39 = vmul.f32 %v2696_v37, %v962_v57  ;;  %vm1446_vm14 = vweird.f32 %v2669_v8 }
 0x1fc   :  { %v1429_v31 = vmul.f32 %v2126_v20, %v1428_v21  ;;  %v1183_v32 = vsub.f32 0.0, %v1145_v23  ;;  %v1939_v58 = vmul.f32 %v2628_v30, %v1424_v29  ;;  %vm1451_vm0 = vcmp.eq.f32.partialorder %v1450_v59, 8.507059e+37 }
 0x1fd   :  { %v865_v33 = vadd.f32 %v864_v15, %v761_v24  ;;  %1064 = vadd.xlane.f32.xlu1 %v1004_v39  ;;  %v1453_v61 = vor.u32 1.1754944e-38, %v1452_v63  ;;  %vm1296_vm7 = vcmp.ge.f32.partialorder %v2651_v52, 0.0 }
 0x1fe   :  { %v1430_v41 = vadd.f32 %v2126_v20, %v1429_v31  ;;  %v1228_v36 = vmul.f32 1.442695, %v1183_v32  ;;  %v1977_v30 = vsel %vm1293_vm8, %v1424_v29, %v1939_v58 }
 0x1ff   :  { %v2128_v34 = vpop.eup %2127  ;;  %v1037_v38 = vpop.xlane.xlu2 %1036  ;;  %v925_v43 = vmul.f32 0.2, %v865_v33  ;;  %2016 = vst.msk [vmem:[%s3273_s7 + $0x18] sm:$0xff] %vm2012_vm6, %v1977_v30 }
 0x200   :  { %v2699_v18 = vpop.eup %2129  ;;  %v1442_v42 = vmul.f32 %v2128_v34, %v2669_v8  ;;  %v1434_v45 = vsel %vm1433_vm11, %v2126_v20, %v1430_v41  ;;  %2131 = vpow2.f32 %v1228_v36  ;;  %v2711_v48 = vadd.f32 %v2550_v14, %v1037_v38 }
 0x201   :  { %v2708_v46 = vadd.f32 1.0, %v2699_v18  ;;  %v763_v49 = vpop.f32.mrf.mxu2  ;;  %v1439_v51 = vsel %vm2689_vm10, %v1438_v40, %v1434_v45  ;;  %v963_v54 = vmax.f32 %v865_v33, %v925_v43  ;;  %vm1447_vm13 = vweird.f32 %v2128_v34 }
 0x202   :  { %v867_v50 = vpop.f32.mrf.mxu3  ;;  %v1443_v53 = vsub.f32 1.0, %v1442_v42  ;;  %v764_v55 = vadd.f32 %v2683_v28, %v763_v49  ;;  %v1940_v56 = vmul.f32 %v2645_v44, %v1439_v51  ;;  %v1146_v1 = vand.u32 2147483647, %v2711_v48  ;;  %vm1448_vm15 = vmor %vm1446_vm14, %vm1447_vm13 }
 0x203   :  { %2133 = vrcp.f32 %v2708_v46  ;;  %v1005_v47 = vmul.f32 %v2696_v37, %v963_v54  ;;  %v1465_v25 = vand.u32 2147483647, %v2708_v46  ;;  %vm1461_vm3 = vweird.f32 %v2708_v46 }
 0x204   :  { %v1444_v0 = vmul.f32 %v2128_v34, %v1443_v53  ;;  %v1978_v3 = vsel %vm1294_vm12, %v1439_v51, %v1940_v56  ;;  %v868_v4 = vadd.f32 %v867_v50, %v764_v55  ;;  %v1184_v6 = vsub.f32 0.0, %v1146_v1 }
 0x205   :  { %2017 = vst.msk [vmem:[%s3273_s7 + $0x20] sm:$0xff] %vm2012_vm6, %v1978_v3  ;;  %1066 = vadd.xlane.f32.xlu2 %v1005_v47  ;;  %vm1466_vm5 = vcmp.eq.f32.partialorder %v1465_v25, 8.507059e+37  ;;  %vm1297_vm12 = vcmp.ge.f32.partialorder %v2672_v62, 0.0 }
 0x206   :  { %v1445_v44 = vadd.f32 %v2128_v34, %v1444_v0  ;;  %v2728_v2 = vpop.eup %2131  ;;  %v926_v7 = vmul.f32 0.2, %v868_v4  ;;  %v1230_v20 = vmul.f32 1.442695, %v1184_v6 }
 0x207   :  { %v1039_v9 = vpop.xlane.xlu0 %1038  ;;  %v2731_v11 = vadd.f32 1.0, %v2728_v2 }
 0x208   :  { %v1449_v10 = vsel %vm1448_vm15, %v2128_v34, %v1445_v44  ;;  %v2734_v60 = vadd.f32 %v2550_v14, %v1039_v9  ;;  %v964_v8 = vmax.f32 %v868_v4, %v926_v7 }
 0x209   :  { %v2134_v12 = vpop.eup %2133  ;;  %v1454_v13 = vsel %vm1451_vm0, %v1453_v61, %v1449_v10  ;;  %v765_v15 = vpop.f32.mrf.mxu2  ;;  %2135 = vrcp.f32 %v2731_v11  ;;  %v1480_v51 = vand.u32 2147483647, %v2731_v11  ;;  %v1482_v53 = vand.u32 2147483648, %v2731_v11 }
 0x20a   :  { %v869_v16 = vpop.f32.mrf.mxu3  ;;  %v1941_v17 = vmul.f32 %v2664_v5, %v1454_v13  ;;  %v1457_v19 = vmul.f32 %v2134_v12, %v2708_v46  ;;  %2137 = vpow2.f32 %v1230_v20  ;;  %v1147_v23 = vand.u32 2147483647, %v2734_v60 }
 0x20b   :  { %v1467_v5 = vand.u32 2147483648, %v2708_v46  ;;  %v766_v27 = vadd.f32 %v2683_v28, %v765_v15  ;;  %v1006_v24 = vmul.f32 %v2696_v37, %v964_v8  ;;  %vm1462_vm2 = vweird.f32 %v2134_v12 }
 0x20c   :  { %v1979_v21 = vsel %vm1295_vm1, %v1454_v13, %v1941_v17  ;;  %v1458_v22 = vsub.f32 1.0, %v1457_v19  ;;  %v1185_v26 = vsub.f32 0.0, %v1147_v23  ;;  %vm1463_vm4 = vmor %vm1461_vm3, %vm1462_vm2  ;;  %vm1476_vm9 = vweird.f32 %v2731_v11 }
 0x20d   :  { %2018 = vst.msk [vmem:[%s3273_s7 + $0x28] sm:$0xff] %vm2012_vm6, %v1979_v21  ;;  %v870_v31 = vadd.f32 %v869_v16, %v766_v27  ;;  %1068 = vadd.xlane.f32.xlu0 %v1006_v24  ;;  %v1468_v35 = vor.u32 1.1754944e-38, %v1467_v5  ;;  %vm1481_vm11 = vcmp.eq.f32.partialorder %v1480_v51, 8.507059e+37  ;;  %v1483_v4 = vor.u32 1.1754944e-38, %v1482_v53 }
 0x20e   :  { %v1459_v29 = vmul.f32 %v2134_v12, %v1458_v22  ;;  %v1232_v33 = vmul.f32 1.442695, %v1185_v26  ;;  %vm1298_vm1 = vcmp.ge.f32.partialorder %v2711_v48, 0.0 }
 0x20f   :  { %v1041_v57 = vpop.xlane.xlu1 %1040  ;;  %v2136_v32 = vpop.eup %2135  ;;  %v927_v39 = vmul.f32 0.2, %v870_v31 }
 0x210   :  { %v1460_v58 = vadd.f32 %v2134_v12, %v1459_v29  ;;  %v2751_v34 = vadd.f32 %v2550_v14, %v1041_v57  ;;  %v2753_v41 = vpop.eup %2137  ;;  %v1472_v36 = vmul.f32 %v2136_v32, %v2731_v11  ;;  %2139 = vpow2.f32 %v1232_v33 }
 0x211   :  { %v768_v38 = vpop.f32.mrf.mxu2  ;;  %v2757_v42 = vadd.f32 1.0, %v2753_v41  ;;  %v965_v49 = vmax.f32 %v870_v31, %v927_v39  ;;  %vm1477_vm8 = vweird.f32 %v2136_v32 }
 0x212   :  { %v872_v30 = vpop.f32.mrf.mxu3  ;;  %v1464_v40 = vsel %vm1463_vm4, %v2134_v12, %v1460_v58  ;;  %v1148_v43 = vand.u32 2147483647, %v2751_v34  ;;  %v1473_v46 = vsub.f32 1.0, %v1472_v36  ;;  %v769_v56 = vadd.f32 %v2683_v28, %v768_v38  ;;  %vm1478_vm10 = vmor %vm1476_vm9, %vm1477_vm8 }
 0x213   :  { %v1469_v45 = vsel %vm1466_vm5, %v1468_v35, %v1464_v40  ;;  %2141 = vrcp.f32 %v2757_v42  ;;  %v1007_v63 = vmul.f32 %v2696_v37, %v965_v49  ;;  %v1495_v22 = vand.u32 2147483647, %v2757_v42 }
 0x214   :  { %v1942_v50 = vmul.f32 %v2699_v18, %v1469_v45  ;;  %v1474_v54 = vmul.f32 %v2136_v32, %v1473_v46  ;;  %v1186_v55 = vsub.f32 0.0, %v1148_v43  ;;  %v873_v0 = vadd.f32 %v872_v30, %v769_v56 }
 0x215   :  { %1070 = vadd.xlane.f32.xlu1 %v1007_v63  ;;  %vm1491_vm14 = vweird.f32 %v2757_v42  ;;  %vm1496_vm0 = vcmp.eq.f32.partialorder %v1495_v22, 8.507059e+37 }
 0x216   :  { %v1980_v59 = vsel %vm1296_vm7, %v1469_v45, %v1942_v50  ;;  %v1475_v52 = vadd.f32 %v2136_v32, %v1474_v54  ;;  %v1234_v18 = vmul.f32 1.442695, %v1186_v55  ;;  %v2772_v3 = vpop.eup %2139  ;;  %v928_v61 = vmul.f32 0.2, %v873_v0 }
 0x217   :  { %2019 = vst.msk [vmem:[%s3273_s7 + $0x30] sm:$0xff] %vm2012_vm6, %v1980_v59  ;;  %v1043_v1 = vpop.xlane.xlu2 %1042  ;;  %v2778_v6 = vadd.f32 1.0, %v2772_v3  ;;  %vm1299_vm7 = vcmp.ge.f32.partialorder %v2734_v60, 0.0 }
 0x218   :  { %v2775_v47 = vadd.f32 %v2550_v14, %v1043_v1  ;;  %v1479_v44 = vsel %vm1478_vm10, %v2136_v32, %v1475_v52  ;;  %2143 = vpow2.f32 %v1234_v18  ;;  %v966_v15 = vmax.f32 %v873_v0, %v928_v61 }
 0x219   :  { %v770_v7 = vpop.f32.mrf.mxu2  ;;  %v2142_v10 = vpop.eup %2141  ;;  %v1484_v11 = vsel %vm1481_vm11, %v1483_v4, %v1479_v44  ;;  %2145 = vrcp.f32 %v2778_v6  ;;  %v1510_v45 = vand.u32 2147483647, %v2778_v6  ;;  %v1512_v46 = vand.u32 2147483648, %v2778_v6 }
 0x21a   :  { %v874_v9 = vpop.f32.mrf.mxu3  ;;  %v1149_v20 = vand.u32 2147483647, %v2775_v47  ;;  %v771_v12 = vadd.f32 %v2683_v28, %v770_v7  ;;  %v1943_v13 = vmul.f32 %v2728_v2, %v1484_v11  ;;  %v1487_v8 = vmul.f32 %v2142_v10, %v2757_v42 }
 0x21b   :  { %v1497_v2 = vand.u32 2147483648, %v2757_v42  ;;  %v1008_v23 = vmul.f32 %v2696_v37, %v966_v15  ;;  %vm1492_vm13 = vweird.f32 %v2142_v10  ;;  %vm1506_vm3 = vweird.f32 %v2778_v6 }
 0x21c   :  { %v1981_v16 = vsel %vm1297_vm12, %v1484_v11, %v1943_v13  ;;  %v1488_v17 = vsub.f32 1.0, %v1487_v8  ;;  %v1187_v19 = vsub.f32 0.0, %v1149_v20  ;;  %v875_v21 = vadd.f32 %v874_v9, %v771_v12  ;;  %vm1493_vm15 = vmor %vm1491_vm14, %vm1492_vm13 }
 0x21d   :  { %2020 = vst.msk [vmem:[%s3273_s7 + $0x38] sm:$0xff] %vm2012_vm6, %v1981_v16  ;;  %1072 = vadd.xlane.f32.xlu2 %v1008_v23  ;;  %v1498_v33 = vor.u32 1.1754944e-38, %v1497_v2  ;;  %v1513_v0 = vor.u32 1.1754944e-38, %v1512_v46  ;;  %vm1511_vm5 = vcmp.eq.f32.partialorder %v1510_v45, 8.507059e+37  ;;  %vm1300_vm12 = vcmp.ge.f32.partialorder %v2751_v34, 0.0 }
 0x21e   :  { %v2793_v25 = vpop.eup %2143  ;;  %v1489_v5 = vmul.f32 %v2142_v10, %v1488_v17  ;;  %v1236_v62 = vmul.f32 1.442695, %v1187_v19  ;;  %v929_v27 = vmul.f32 0.2, %v875_v21 }
 0x21f   :  { %v1045_v24 = vpop.xlane.xlu0 %1044  ;;  %v2796_v29 = vadd.f32 1.0, %v2793_v25  ;;  %v2146_v31 = vpop.eup %2145 }
 0x220   :  { %v2799_v26 = vadd.f32 %v2550_v14, %v1045_v24  ;;  %v1490_v57 = vadd.f32 %v2142_v10, %v1489_v5  ;;  %2147 = vpow2.f32 %v1236_v62  ;;  %v1502_v35 = vmul.f32 %v2146_v31, %v2778_v6 }
 0x221   :  { %v773_v32 = vpop.f32.mrf.mxu2  ;;  %2149 = vrcp.f32 %v2796_v29  ;;  %v967_v36 = vmax.f32 %v875_v21, %v929_v27  ;;  %vm1507_vm2 = vweird.f32 %v2146_v31  ;;  %v1525_v11 = vand.u32 2147483647, %v2796_v29 }
 0x222   :  { %v877_v58 = vpop.f32.mrf.mxu3  ;;  %v1494_v39 = vsel %vm1493_vm15, %v2142_v10, %v1490_v57  ;;  %v1150_v38 = vand.u32 2147483647, %v2799_v26  ;;  %v1503_v40 = vsub.f32 1.0, %v1502_v35  ;;  %v774_v42 = vadd.f32 %v2683_v28, %v773_v32  ;;  %vm1508_vm4 = vmor %vm1506_vm3, %vm1507_vm2 }
 0x223   :  { %v1499_v30 = vsel %vm1496_vm0, %v1498_v33, %v1494_v39  ;;  %v1009_v53 = vmul.f32 %v2696_v37, %v967_v36  ;;  %v1527_v20 = vand.u32 2147483648, %v2796_v29  ;;  %vm1521_vm9 = vweird.f32 %v2796_v29 }
 0x224   :  { %v1944_v43 = vmul.f32 %v2753_v41, %v1499_v30  ;;  %v1188_v49 = vsub.f32 0.0, %v1150_v38  ;;  %v1504_v50 = vmul.f32 %v2146_v31, %v1503_v40  ;;  %v878_v51 = vadd.f32 %v877_v58, %v774_v42 }
 0x225   :  { %1074 = vadd.xlane.f32.xlu0 %v1009_v53  ;;  %v1528_v2 = vor.u32 1.1754944e-38, %v1527_v20  ;;  %vm1526_vm11 = vcmp.eq.f32.partialorder %v1525_v11, 8.507059e+37 }
 0x226   :  { %v2811_v54 = vpop.eup %2147  ;;  %v1982_v55 = vsel %vm1298_vm1, %v1499_v30, %v1944_v43  ;;  %v1238_v48 = vmul.f32 1.442695, %v1188_v49  ;;  %v1505_v41 = vadd.f32 %v2146_v31, %v1504_v50  ;;  %v930_v52 = vmul.f32 0.2, %v878_v51 }
 0x227   :  { %v1047_v56 = vpop.xlane.xlu1 %1046  ;;  %v2150_v59 = vpop.eup %2149  ;;  %2021 = vst.msk [vmem:[%s3273_s7 + $0x40] sm:$0xff] %vm2012_vm6, %v1982_v55  ;;  %v2819_v63 = vadd.f32 1.0, %v2811_v54  ;;  %vm1301_vm1 = vcmp.ge.f32.partialorder %v2775_v47, 0.0 }
 0x228   :  { %v2822_v18 = vadd.f32 %v2550_v14, %v1047_v56  ;;  %v1517_v1 = vmul.f32 %v2150_v59, %v2796_v29  ;;  %2151 = vpow2.f32 %v1238_v48  ;;  %v1509_v6 = vsel %vm1508_vm4, %v2146_v31, %v1505_v41 }
 0x229   :  { %v775_v4 = vpop.f32.mrf.mxu2  ;;  %2153 = vrcp.f32 %v2819_v63  ;;  %v1514_v61 = vsel %vm1511_vm5, %v1513_v0, %v1509_v6  ;;  %v968_v9 = vmax.f32 %v878_v51, %v930_v52  ;;  %vm1522_vm8 = vweird.f32 %v2150_v59 }
 0x22a   :  { %v879_v44 = vpop.f32.mrf.mxu3  ;;  %v1518_v7 = vsub.f32 1.0, %v1517_v1  ;;  %v1945_v10 = vmul.f32 %v2772_v3, %v1514_v61  ;;  %v1151_v12 = vand.u32 2147483647, %v2822_v18  ;;  %v776_v8 = vadd.f32 %v2683_v28, %v775_v4  ;;  %vm1523_vm10 = vmor %vm1521_vm9, %vm1522_vm8 }
 0x22b   :  { %v1010_v15 = vmul.f32 %v2696_v37, %v968_v9  ;;  %v1540_v35 = vand.u32 2147483647, %v2819_v63  ;;  %vm1536_vm14 = vweird.f32 %v2819_v63 }
 0x22c   :  { %v1519_v13 = vmul.f32 %v2150_v59, %v1518_v7  ;;  %v1983_v16 = vsel %vm1299_vm7, %v1514_v61, %v1945_v10  ;;  %v1189_v17 = vsub.f32 0.0, %v1151_v12  ;;  %v880_v19 = vadd.f32 %v879_v44, %v776_v8 }
 0x22d   :  { %2022 = vst.msk [vmem:[%s3273_s7 + $0x48] sm:$0xff] %vm2012_vm6, %v1983_v16  ;;  %1076 = vadd.xlane.f32.xlu1 %v1010_v15  ;;  %vm1541_vm0 = vcmp.eq.f32.partialorder %v1540_v35, 8.507059e+37  ;;  %vm1302_vm7 = vcmp.ge.f32.partialorder %v2799_v26, 0.0 }
 0x22e   :  { %v2834_v60 = vpop.eup %2151  ;;  %v1520_v3 = vadd.f32 %v2150_v59, %v1519_v13  ;;  %v1240_v5 = vmul.f32 1.442695, %v1189_v17  ;;  %v931_v31 = vmul.f32 0.2, %v880_v19 }
 0x22f   :  { %v1049_v21 = vpop.xlane.xlu2 %1048  ;;  %v2154_v22 = vpop.eup %2153  ;;  %v2842_v23 = vadd.f32 1.0, %v2834_v60 }
 0x230   :  { %v2845_v62 = vadd.f32 %v2550_v14, %v1049_v21  ;;  %v1524_v27 = vsel %vm1523_vm10, %v2150_v59, %v1520_v3  ;;  %v1532_v24 = vmul.f32 %v2154_v22, %v2819_v63  ;;  %v1542_v14 = vand.u32 2147483648, %v2819_v63  ;;  %v2867_v63 = vld [vmem:[#allocation2] ss:$0 sm:$0xff] }
 0x231   :  { %v778_v57 = vpop.f32.mrf.mxu2  ;;  %v1529_v32 = vsel %vm1526_vm11, %v1528_v2, %v1524_v27  ;;  %2155 = vrcp.f32 %v2842_v23  ;;  %v969_v36 = vmax.f32 %v880_v19, %v931_v31  ;;  %vm1537_vm13 = vweird.f32 %v2154_v22 }
 0x232   :  { %v882_v29 = vpop.f32.mrf.mxu3  ;;  %v1946_v58 = vmul.f32 %v2793_v25, %v1529_v32  ;;  %v1533_v33 = vsub.f32 1.0, %v1532_v24  ;;  %2157 = vpow2.f32 %v1240_v5  ;;  %v1152_v39 = vand.u32 2147483647, %v2845_v62  ;;  %vm1538_vm15 = vmor %vm1536_vm14, %vm1537_vm13 }
 0x233   :  { %v779_v40 = vadd.f32 %v2683_v28, %v778_v57  ;;  %v1011_v25 = vmul.f32 %v2696_v37, %v969_v36  ;;  %v1543_v46 = vor.u32 1.1754944e-38, %v1542_v14  ;;  %v1555_v61 = vand.u32 2147483647, %v2842_v23 }
 0x234   :  { %v1984_v38 = vsel %vm1300_vm12, %v1529_v32, %v1946_v58  ;;  %v1534_v30 = vmul.f32 %v2154_v22, %v1533_v33  ;;  %v1190_v34 = vsub.f32 0.0, %v1152_v39  ;;  %v1557_v7 = vand.u32 2147483648, %v2842_v23 }
 0x235   :  { %2023 = vst.msk [vmem:[%s3273_s7 + $0x50] sm:$0xff] %vm2012_vm6, %v1984_v38  ;;  %v883_v43 = vadd.f32 %v882_v29, %v779_v40  ;;  %1078 = vadd.xlane.f32.xlu2 %v1011_v25  ;;  %vm1551_vm3 = vweird.f32 %v2842_v23  ;;  %vm1556_vm5 = vcmp.eq.f32.partialorder %v1555_v61, 8.507059e+37  ;;  %vm1303_vm12 = vcmp.ge.f32.partialorder %v2822_v18, 0.0 }
 0x236   :  { %v1535_v42 = vadd.f32 %v2154_v22, %v1534_v30  ;;  %v1242_v49 = vmul.f32 1.442695, %v1190_v34  ;;  %v1558_v8 = vor.u32 1.1754944e-38, %v1557_v7 }
 0x237   :  { %v2156_v45 = vpop.eup %2155  ;;  %v1051_v50 = vpop.xlane.xlu0 %1050  ;;  %v932_v48 = vmul.f32 0.2, %v883_v43 }
 0x238   :  { %v2861_v51 = vpop.eup %2157  ;;  %v1539_v53 = vsel %vm1538_vm15, %v2154_v22, %v1535_v42  ;;  %v1547_v55 = vmul.f32 %v2156_v45, %v2842_v23  ;;  %2159 = vpow2.f32 %v1242_v49  ;;  %v2870_v0 = vadd.f32 %v2867_v63, %v1051_v50 }
 0x239   :  { %v780_v56 = vpop.f32.mrf.mxu2  ;;  %v1544_v41 = vsel %vm1541_vm0, %v1543_v46, %v1539_v53  ;;  %v2865_v52 = vadd.f32 1.0, %v2861_v51  ;;  %v970_v44 = vmax.f32 %v883_v43, %v932_v48  ;;  %vm1552_vm2 = vweird.f32 %v2156_v45 }
 0x23a   :  { %v884_v59 = vpop.f32.mrf.mxu3  ;;  %v1947_v1 = vmul.f32 %v2811_v54, %v1544_v41  ;;  %v1548_v4 = vsub.f32 1.0, %v1547_v55  ;;  %v781_v6 = vadd.f32 %v2683_v28, %v780_v56  ;;  %v1153_v11 = vand.u32 2147483647, %v2870_v0  ;;  %vm1553_vm4 = vmor %vm1551_vm3, %vm1552_vm2 }
 0x23b   :  { %2161 = vrcp.f32 %v2865_v52  ;;  %v1012_v20 = vmul.f32 %v2696_v37, %v970_v44  ;;  %v1570_v58 = vand.u32 2147483647, %v2865_v52  ;;  %vm1566_vm9 = vweird.f32 %v2865_v52 }
 0x23c   :  { %v1985_v9 = vsel %vm1301_vm1, %v1544_v41, %v1947_v1  ;;  %v1549_v10 = vmul.f32 %v2156_v45, %v1548_v4  ;;  %v885_v54 = vadd.f32 %v884_v59, %v781_v6  ;;  %v1191_v12 = vsub.f32 0.0, %v1153_v11 }
 0x23d   :  { %2024 = vst.msk [vmem:[%s3273_s7 + $0x58] sm:$0xff] %vm2012_vm6, %v1985_v9  ;;  %1080 = vadd.xlane.f32.xlu0 %v1012_v20  ;;  %vm2907_vm10 = vcmp.eq.f32.partialorder %v1570_v58, 8.507059e+37  ;;  %vm1304_vm1 = vcmp.ge.f32.partialorder %v2845_v62, 0.0 }
 0x23e   :  { %v1550_v47 = vadd.f32 %v2156_v45, %v1549_v10  ;;  %v2885_v13 = vpop.eup %2159  ;;  %v933_v15 = vmul.f32 0.2, %v885_v54  ;;  %v1244_v19 = vmul.f32 1.442695, %v1191_v12 }
 0x23f   :  { %v1053_v16 = vpop.xlane.xlu1 %1052  ;;  %v2888_v3 = vadd.f32 1.0, %v2885_v13 }
 0x240   :  { %v1554_v17 = vsel %vm1553_vm4, %v2156_v45, %v1550_v47  ;;  %v2891_v21 = vadd.f32 %v2867_v63, %v1053_v16  ;;  %v971_v27 = vmax.f32 %v885_v54, %v933_v15 }
 0x241   :  { %v783_v22 = vpop.f32.mrf.mxu2  ;;  %v2162_v23 = vpop.eup %2161  ;;  %v1559_v5 = vsel %vm1556_vm5, %v1558_v8, %v1554_v17  ;;  %2163 = vrcp.f32 %v2888_v3  ;;  %v1585_v4 = vand.u32 2147483647, %v2888_v3  ;;  %v1587_v44 = vand.u32 2147483648, %v2888_v3 }
 0x242   :  { %v887_v2 = vpop.f32.mrf.mxu3  ;;  %v784_v24 = vadd.f32 %v2683_v28, %v783_v22  ;;  %v1948_v31 = vmul.f32 %v2834_v60, %v1559_v5  ;;  %v1562_v57 = vmul.f32 %v2162_v23, %v2865_v52  ;;  %2165 = vpow2.f32 %v1244_v19 }
 0x243   :  { %v1154_v33 = vand.u32 2147483647, %v2891_v21  ;;  %v1572_v60 = vand.u32 2147483648, %v2865_v52  ;;  %v1013_v14 = vmul.f32 %v2696_v37, %v971_v27  ;;  %vm1567_vm8 = vweird.f32 %v2162_v23 }
 0x244   :  { %v1986_v29 = vsel %vm1302_vm7, %v1559_v5, %v1948_v31  ;;  %v1563_v32 = vsub.f32 1.0, %v1562_v57  ;;  %v888_v35 = vadd.f32 %v887_v2, %v784_v24  ;;  %vm1568_vm11 = vmor %vm1566_vm9, %vm1567_vm8  ;;  %vm1581_vm14 = vweird.f32 %v2888_v3 }
 0x245   :  { %2025 = vst.msk [vmem:[%s3273_s7 + $0x60] sm:$0xff] %vm2012_vm6, %v1986_v29  ;;  %v1192_v26 = vsub.f32 0.0, %v1154_v33  ;;  %1082 = vadd.xlane.f32.xlu1 %v1013_v14  ;;  %v1573_v45 = vor.u32 1.1754944e-38, %v1572_v60  ;;  %v1588_v20 = vor.u32 1.1754944e-38, %v1587_v44  ;;  %vm1586_vm0 = vcmp.eq.f32.partialorder %v1585_v4, 8.507059e+37 }
 0x246   :  { %v1564_v36 = vmul.f32 %v2162_v23, %v1563_v32  ;;  %v934_v39 = vmul.f32 0.2, %v888_v35  ;;  %vm1305_vm5 = vcmp.ge.f32.partialorder %v2870_v0, 0.0  ;;  %vm1306_vm9 = vcmp.ge.f32.partialorder %v2891_v21, 0.0 }
 0x247   :  { %v2164_v38 = vpop.eup %2163  ;;  %v1246_v34 = vmul.f32 1.442695, %v1192_v26  ;;  %v1055_v25 = vpop.xlane.xlu2 %1054 }
 0x248   :  { %v1565_v30 = vadd.f32 %v2162_v23, %v1564_v36  ;;  %v2911_v43 = vpop.eup %2165  ;;  %v1577_v46 = vmul.f32 %v2164_v38, %v2888_v3  ;;  %v972_v49 = vmax.f32 %v888_v35, %v934_v39  ;;  %v2915_v50 = vadd.f32 %v2867_v63, %v1055_v25 }
 0x249   :  { %v785_v42 = vpop.f32.mrf.mxu2  ;;  %v2918_v48 = vadd.f32 1.0, %v2911_v43  ;;  %2167 = vpow2.f32 %v1246_v34  ;;  %vm1582_vm13 = vweird.f32 %v2164_v38 }
 0x24a   :  { %v889_v53 = vpop.f32.mrf.mxu3  ;;  %v1569_v55 = vsel %vm1568_vm11, %v2162_v23, %v1565_v30  ;;  %v786_v56 = vadd.f32 %v2683_v28, %v785_v42  ;;  %v1578_v41 = vsub.f32 1.0, %v1577_v46  ;;  %v1155_v52 = vand.u32 2147483647, %v2915_v50  ;;  %vm1583_vm15 = vmor %vm1581_vm14, %vm1582_vm13 }
 0x24b   :  { %v1574_v59 = vsel %vm2907_vm10, %v1573_v45, %v1569_v55  ;;  %2169 = vrcp.f32 %v2918_v48  ;;  %v1014_v18 = vmul.f32 %v2696_v37, %v972_v49  ;;  %v1602_v29 = vand.u32 2147483648, %v2918_v48 }
 0x24c   :  { %v1949_v1 = vmul.f32 %v2861_v51, %v1574_v59  ;;  %v1579_v6 = vmul.f32 %v2164_v38, %v1578_v41  ;;  %v1193_v61 = vsub.f32 0.0, %v1155_v52  ;;  %v890_v7 = vadd.f32 %v889_v53, %v786_v56 }
 0x24d   :  { %1084 = vadd.xlane.f32.xlu2 %v1014_v18  ;;  %v1600_v62 = vand.u32 2147483647, %v2918_v48  ;;  %vm1596_vm3 = vweird.f32 %v2918_v48  ;;  %v1603_v25 = vor.u32 1.1754944e-38, %v1602_v29 }
 0x24e   :  { %v1987_v9 = vsel %vm1303_vm12, %v1574_v59, %v1949_v1  ;;  %v1580_v10 = vadd.f32 %v2164_v38, %v1579_v6  ;;  %v1248_v51 = vmul.f32 1.442695, %v1193_v61  ;;  %v935_v11 = vmul.f32 0.2, %v890_v7 }
 0x24f   :  { %2026 = vst.msk [vmem:[%s3273_s7 + $0x68] sm:$0xff] %vm2012_vm6, %v1987_v9  ;;  %v2935_v54 = vpop.eup %2167  ;;  %v1057_v47 = vpop.xlane.xlu0 %1056  ;;  %vm1601_vm7 = vcmp.eq.f32.partialorder %v1600_v62, 8.507059e+37 }
 0x250   :  { %v1584_v8 = vsel %vm1583_vm15, %v2164_v38, %v1580_v10  ;;  %v2938_v15 = vadd.f32 1.0, %v2935_v54  ;;  %2171 = vpow2.f32 %v1248_v51  ;;  %v973_v22 = vmax.f32 %v890_v7, %v935_v11 }
 0x251   :  { %v788_v12 = vpop.f32.mrf.mxu2  ;;  %v2170_v17 = vpop.eup %2169  ;;  %v1589_v19 = vsel %vm1586_vm0, %v1588_v20, %v1584_v8  ;;  %v2941_v3 = vadd.f32 %v2867_v63, %v1057_v47 }
 0x252   :  { %v892_v16 = vpop.f32.mrf.mxu3  ;;  %v789_v2 = vadd.f32 %v2683_v28, %v788_v12  ;;  %v1950_v23 = vmul.f32 %v2885_v13, %v1589_v19  ;;  %v1592_v5 = vmul.f32 %v2170_v17, %v2918_v48  ;;  %2173 = vrcp.f32 %v2938_v15 }
 0x253   :  { %v1156_v27 = vand.u32 2147483647, %v2941_v3  ;;  %v1015_v13 = vmul.f32 %v2696_v37, %v973_v22  ;;  %vm1597_vm2 = vweird.f32 %v2170_v17  ;;  %v1615_v56 = vand.u32 2147483647, %v2938_v15 }
 0x254   :  { %v1988_v24 = vsel %vm1304_vm1, %v1589_v19, %v1950_v23  ;;  %v1593_v31 = vsub.f32 1.0, %v1592_v5  ;;  %v893_v57 = vadd.f32 %v892_v16, %v789_v2  ;;  %vm1598_vm4 = vmor %vm1596_vm3, %vm1597_vm2  ;;  %v1617_v59 = vand.u32 2147483648, %v2938_v15 }
 0x255   :  { %2027 = vst.msk [vmem:[%s3273_s7 + $0x70] sm:$0xff] %vm2012_vm6, %v1988_v24  ;;  %v1194_v32 = vsub.f32 0.0, %v1156_v27  ;;  %1086 = vadd.xlane.f32.xlu0 %v1015_v13  ;;  %vm1611_vm10 = vweird.f32 %v2938_v15  ;;  %vm1616_vm12 = vcmp.eq.f32.partialorder %v1615_v56, 8.507059e+37  ;;  %vm1307_vm1 = vcmp.ge.f32.partialorder %v2915_v50, 0.0 }
 0x256   :  { %v2955_v58 = vpop.eup %2171  ;;  %v1594_v33 = vmul.f32 %v2170_v17, %v1593_v31  ;;  %v936_v60 = vmul.f32 0.2, %v893_v57  ;;  %v1618_v0 = vor.u32 1.1754944e-38, %v1617_v59 }
 0x257   :  { %v2959_v35 = vadd.f32 1.0, %v2955_v58  ;;  %v1250_v14 = vmul.f32 1.442695, %v1194_v32 }
 0x258   :  { %v2174_v26 = vpop.eup %2173  ;;  %v1595_v39 = vadd.f32 %v2170_v17, %v1594_v33  ;;  %v974_v38 = vmax.f32 %v893_v57, %v936_v60  ;;  %v1059_v30 = vpop.xlane.xlu1 %1058 }
 0x259   :  { %v790_v36 = vpop.f32.mrf.mxu2  ;;  %v1607_v42 = vmul.f32 %v2174_v26, %v2938_v15  ;;  %2175 = vrcp.f32 %v2959_v35  ;;  %v2967_v53 = vadd.f32 %v2867_v63, %v1059_v30  ;;  %vm1612_vm8 = vweird.f32 %v2174_v26 }
 0x25a   :  { %v791_v40 = vadd.f32 %v2683_v28, %v790_v36  ;;  %v894_v34 = vpop.f32.mrf.mxu3  ;;  %v1599_v45 = vsel %vm1598_vm4, %v2170_v17, %v1595_v39  ;;  %2177 = vpow2.f32 %v1250_v14  ;;  %v1016_v41 = vmul.f32 %v2696_v37, %v974_v38  ;;  %vm1613_vm11 = vmor %vm1611_vm10, %vm1612_vm8 }
 0x25b   :  { %v1604_v46 = vsel %vm1601_vm7, %v1603_v25, %v1599_v45  ;;  %v1608_v49 = vsub.f32 1.0, %v1607_v42  ;;  %v1157_v1 = vand.u32 2147483647, %v2967_v53  ;;  %v1630_v23 = vand.u32 2147483647, %v2959_v35 }
 0x25c   :  { %v895_v55 = vadd.f32 %v894_v34, %v791_v40  ;;  %v1951_v48 = vmul.f32 %v2911_v43, %v1604_v46  ;;  %1088 = vadd.xlane.f32.xlu1 %v1016_v41  ;;  %v1632_v5 = vand.u32 2147483648, %v2959_v35  ;;  %vm1626_vm14 = vweird.f32 %v2959_v35 }
 0x25d   :  { %v1609_v52 = vmul.f32 %v2174_v26, %v1608_v49  ;;  %v1195_v61 = vsub.f32 0.0, %v1157_v1  ;;  %vm1631_vm0 = vcmp.eq.f32.partialorder %v1630_v23, 8.507059e+37  ;;  %vm1308_vm7 = vcmp.ge.f32.partialorder %v2941_v3, 0.0 }
 0x25e   :  { %v937_v4 = vmul.f32 0.2, %v895_v55  ;;  %v1989_v44 = vsel %vm1305_vm5, %v1604_v46, %v1951_v48  ;;  %v1633_v32 = vor.u32 1.1754944e-38, %v1632_v5 }
 0x25f   :  { %v2176_v6 = vpop.eup %2175  ;;  %2028 = vst.msk [vmem:[%s3273_s7 + $0x78] sm:$0xff] %vm2012_vm6, %v1989_v44  ;;  %v1610_v43 = vadd.f32 %v2174_v26, %v1609_v52  ;;  %v1252_v47 = vmul.f32 1.442695, %v1195_v61 }
 0x260   :  { %v975_v7 = vmax.f32 %v895_v55, %v937_v4  ;;  %v2982_v18 = vpop.eup %2177  ;;  %v1622_v10 = vmul.f32 %v2176_v6, %v2959_v35  ;;  %v1061_v12 = vpop.xlane.xlu2 %1060  ;;  %vm1627_vm13 = vweird.f32 %v2176_v6 }
 0x261   :  { %v793_v9 = vpop.f32.mrf.mxu2  ;;  %v1614_v11 = vsel %vm1613_vm11, %v2174_v26, %v1610_v43  ;;  %v2987_v20 = vadd.f32 1.0, %v2982_v18  ;;  %v2991_v19 = vadd.f32 %v2867_v63, %v1061_v12  ;;  %vm1628_vm15 = vmor %vm1626_vm14, %vm1627_vm13  ;;  %vm1309_vm13 = vcmp.ge.f32.partialorder %v2967_v53, 0.0 }
 0x262   :  { %v794_v51 = vadd.f32 %v2683_v28, %v793_v9  ;;  %v897_v8 = vpop.f32.mrf.mxu3  ;;  %v1017_v15 = vmul.f32 %v2696_v37, %v975_v7  ;;  %v1619_v16 = vsel %vm1616_vm12, %v1618_v0, %v1614_v11  ;;  %v1623_v17 = vsub.f32 1.0, %v1622_v10 }
 0x263   :  { %v1952_v2 = vmul.f32 %v2935_v54, %v1619_v16  ;;  %2179 = vrcp.f32 %v2987_v20  ;;  %v1158_v24 = vand.u32 2147483647, %v2991_v19  ;;  %v1647_v49 = vand.u32 2147483648, %v2987_v20 }
 0x264   :  { %v898_v22 = vadd.f32 %v897_v8, %v794_v51  ;;  %1090 = vadd.xlane.f32.xlu2 %v1017_v15  ;;  %v1624_v27 = vmul.f32 %v2176_v6, %v1623_v17  ;;  %2181 = vpow2.f32 %v1252_v47  ;;  %vm1641_vm3 = vweird.f32 %v2987_v20 }
 0x265   :  { %v1990_v31 = vsel %vm1306_vm9, %v1619_v16, %v1952_v2  ;;  %v1196_v29 = vsub.f32 0.0, %v1158_v24  ;;  %v1648_v1 = vor.u32 1.1754944e-38, %v1647_v49 }
 0x266   :  { %v938_v57 = vmul.f32 0.2, %v898_v22  ;;  %2029 = vst.msk [vmem:[%s3273_s7 + $0x80] sm:$0xff] %vm2012_vm6, %v1990_v31  ;;  %v1625_v54 = vadd.f32 %v2176_v6, %v1624_v27 }
 0x267   :  { %v1254_v60 = vmul.f32 1.442695, %v1196_v29 }
 0x268   :  { %v976_v13 = vmax.f32 %v898_v22, %v938_v57  ;;  %v1629_v62 = vsel %vm1628_vm15, %v2176_v6, %v1625_v54  ;;  %v1063_v14 = vpop.xlane.xlu0 %1062 }
 0x269   :  { %v795_v33 = vpop.f32.mrf.mxu2  ;;  %v2180_v36 = vpop.eup %2179  ;;  %v1634_v26 = vsel %vm1631_vm0, %v1633_v32, %v1629_v62  ;;  %v3007_v39 = vadd.f32 %v2867_v63, %v1063_v14  ;;  %2183 = vpow2.f32 %v1254_v60 }
 0x26a   :  { %v796_v21 = vadd.f32 %v2683_v28, %v795_v33  ;;  %v1018_v38 = vmul.f32 %v2696_v37, %v976_v13  ;;  %v3010_v30 = vpop.eup %2181  ;;  %v1953_v35 = vmul.f32 %v2955_v58, %v1634_v26  ;;  %v1637_v40 = vmul.f32 %v2180_v36, %v2987_v20  ;;  %v899_v34 = vpop.f32.mrf.mxu3 }
 0x26b   :  { %v1347_v25 = vadd.f32 1.0, %v3010_v30  ;;  %v1159_v28 = vand.u32 2147483647, %v3007_v39  ;;  %v1645_v58 = vand.u32 2147483647, %v2987_v20  ;;  %vm1642_vm2 = vweird.f32 %v2180_v36 }
 0x26c   :  { %v900_v42 = vadd.f32 %v899_v34, %v796_v21  ;;  %1092 = vadd.xlane.f32.xlu0 %v1018_v38  ;;  %v1991_v45 = vsel %vm1307_vm1, %v1634_v26, %v1953_v35  ;;  %v1638_v46 = vsub.f32 1.0, %v1637_v40  ;;  %vm1643_vm4 = vmor %vm1641_vm3, %vm1642_vm2  ;;  %vm1310_vm1 = vcmp.ge.f32.partialorder %v2991_v19, 0.0 }
 0x26d   :  { %2030 = vst.msk [vmem:[%s3273_s7 + $0x88] sm:$0xff] %vm2012_vm6, %v1991_v45  ;;  %2185 = vrcp.f32 %v1347_v25  ;;  %v1197_v50 = vsub.f32 0.0, %v1159_v28  ;;  %vm1646_vm5 = vcmp.eq.f32.partialorder %v1645_v58, 8.507059e+37  ;;  %v1662_v20 = vand.u32 2147483648, %v1347_v25 }
 0x26e   :  { %v1639_v55 = vmul.f32 %v2180_v36, %v1638_v46  ;;  %v939_v48 = vmul.f32 0.2, %v900_v42  ;;  %vm1656_vm9 = vweird.f32 %v1347_v25 }
 0x26f   :  { %v3023_v56 = vpop.eup %2183  ;;  %v1256_v41 = vmul.f32 1.442695, %v1197_v50  ;;  %v1663_v23 = vor.u32 1.1754944e-38, %v1662_v20 }
 0x270   :  { %v1640_v59 = vadd.f32 %v2180_v36, %v1639_v55  ;;  %v977_v52 = vmax.f32 %v900_v42, %v939_v48  ;;  %v1348_v4 = vadd.f32 1.0, %v3023_v56  ;;  %v1065_v6 = vpop.xlane.xlu1 %1064 }
 0x271   :  { %2187 = vpow2.f32 %v1256_v41  ;;  %v3031_v10 = vadd.f32 %v2867_v63, %v1065_v6 }
 0x272   :  { %v1644_v44 = vsel %vm1643_vm4, %v2180_v36, %v1640_v59  ;;  %v1019_v43 = vmul.f32 %v2696_v37, %v977_v52  ;;  %2189 = vrcp.f32 %v1348_v4  ;;  %v1660_v37 = vand.u32 2147483647, %v1347_v25 }
 0x273   :  { %v2186_v61 = vpop.eup %2185  ;;  %v1649_v7 = vsel %vm1646_vm5, %v1648_v1, %v1644_v44  ;;  %v1160_v47 = vand.u32 2147483647, %v3031_v10  ;;  %v1675_v54 = vand.u32 2147483647, %v1348_v4  ;;  %v1677_v29 = vand.u32 2147483648, %v1348_v4 }
 0x274   :  { %v1954_v9 = vmul.f32 %v2982_v18, %v1649_v7  ;;  %v1652_v0 = vmul.f32 %v2186_v61, %v1347_v25  ;;  %1094 = vadd.xlane.f32.xlu1 %v1019_v43  ;;  %vm1657_vm8 = vweird.f32 %v2186_v61  ;;  %vm1661_vm11 = vcmp.eq.f32.partialorder %v1660_v37, 8.507059e+37 }
 0x275   :  { %v1198_v16 = vsub.f32 0.0, %v1160_v47  ;;  %vm1658_vm10 = vmor %vm1656_vm9, %vm1657_vm8  ;;  %vm1671_vm14 = vweird.f32 %v1348_v4  ;;  %v1678_v26 = vor.u32 1.1754944e-38, %v1677_v29  ;;  %vm1676_vm0 = vcmp.eq.f32.partialorder %v1675_v54, 8.507059e+37 }
 0x276   :  { %v1992_v51 = vsel %vm1308_vm7, %v1649_v7, %v1954_v9  ;;  %v1653_v11 = vsub.f32 1.0, %v1652_v0  ;;  %vm1311_vm7 = vcmp.ge.f32.partialorder %v3007_v39, 0.0 }
 0x277   :  { %2031 = vst.msk [vmem:[%s3273_s7 + $0x90] sm:$0xff] %vm2012_vm6, %v1992_v51  ;;  %v3038_v12 = vpop.eup %2187  ;;  %v1258_v24 = vmul.f32 1.442695, %v1198_v16 }
 0x278   :  { %v1654_v18 = vmul.f32 %v2186_v61, %v1653_v11  ;;  %v1067_v8 = vpop.xlane.xlu2 %1066  ;;  %v2190_v3 = vpop.eup %2189  ;;  %v1349_v15 = vadd.f32 1.0, %v3038_v12 }
 0x279   :  { %v3042_v17 = vadd.f32 %v2867_v63, %v1067_v8  ;;  %v1667_v2 = vmul.f32 %v2190_v3, %v1348_v4  ;;  %vm1672_vm12 = vweird.f32 %v2190_v3 }
 0x27a   :  { %v1655_v22 = vadd.f32 %v2186_v61, %v1654_v18  ;;  %2191 = vrcp.f32 %v1349_v15  ;;  %vm1673_vm15 = vmor %vm1671_vm14, %vm1672_vm12  ;;  %v1692_v42 = vand.u32 2147483648, %v1349_v15  ;;  %v1690_v55 = vand.u32 2147483647, %v1349_v15 }
 0x27b   :  { %v1668_v27 = vsub.f32 1.0, %v1667_v2  ;;  %v1161_v31 = vand.u32 2147483647, %v3042_v17  ;;  %2193 = vpow2.f32 %v1258_v24  ;;  %vm1686_vm3 = vweird.f32 %v1349_v15 }
 0x27c   :  { %v1659_v5 = vsel %vm1658_vm10, %v2186_v61, %v1655_v22  ;;  %v1693_v19 = vor.u32 1.1754944e-38, %v1692_v42  ;;  %vm1691_vm5 = vcmp.eq.f32.partialorder %v1690_v55, 8.507059e+37  ;;  %vm1312_vm14 = vcmp.ge.f32.partialorder %v3031_v10, 0.0 }
 0x27d   :  { %v1664_v57 = vsel %vm1661_vm11, %v1663_v23, %v1659_v5  ;;  %v1669_v13 = vmul.f32 %v2190_v3, %v1668_v27  ;;  %v1199_v33 = vsub.f32 0.0, %v1161_v31 }
 0x27e   :  { %v1955_v32 = vmul.f32 %v3010_v30, %v1664_v57 }
 0x27f   :  { %v1670_v60 = vadd.f32 %v2190_v3, %v1669_v13  ;;  %v1260_v14 = vmul.f32 1.442695, %v1199_v33 }
 0x280   :  { %v1993_v62 = vsel %vm1309_vm13, %v1664_v57, %v1955_v32  ;;  %v1069_v21 = vpop.xlane.xlu0 %1068  ;;  %v2192_v36 = vpop.eup %2191 }
 0x281   :  { %2032 = vst.msk [vmem:[%s3273_s7 + $0x98] sm:$0xff] %vm2012_vm6, %v1993_v62  ;;  %v3053_v38 = vadd.f32 %v2867_v63, %v1069_v21  ;;  %v1674_v30 = vsel %vm1673_vm15, %v2190_v3, %v1670_v60  ;;  %v1682_v53 = vmul.f32 %v2192_v36, %v1349_v15  ;;  %2195 = vpow2.f32 %v1260_v14  ;;  %v3056_v34 = vpop.eup %2193 }
 0x282   :  { %v1679_v35 = vsel %vm1676_vm0, %v1678_v26, %v1674_v30  ;;  %v1350_v45 = vadd.f32 1.0, %v3056_v34  ;;  %vm1687_vm2 = vweird.f32 %v2192_v36 }
 0x283   :  { %v1162_v40 = vand.u32 2147483647, %v3053_v38  ;;  %v1956_v25 = vmul.f32 %v3023_v56, %v1679_v35  ;;  %v1683_v28 = vsub.f32 1.0, %v1682_v53  ;;  %vm1688_vm4 = vmor %vm1686_vm3, %vm1687_vm2 }
 0x284   :  { %2197 = vrcp.f32 %v1350_v45  ;;  %v1705_v37 = vand.u32 2147483647, %v1350_v45  ;;  %v1707_v20 = vand.u32 2147483648, %v1350_v45  ;;  %vm1701_vm9 = vweird.f32 %v1350_v45 }
 0x285   :  { %v1200_v46 = vsub.f32 0.0, %v1162_v40  ;;  %v1994_v58 = vsel %vm1310_vm1, %v1679_v35, %v1956_v25  ;;  %v1684_v49 = vmul.f32 %v2192_v36, %v1683_v28  ;;  %vm1313_vm1 = vcmp.ge.f32.partialorder %v3042_v17, 0.0 }
 0x286   :  { %2033 = vst.msk [vmem:[%s3273_s7 + $0xa0] sm:$0xff] %vm2012_vm6, %v1994_v58  ;;  %vm1706_vm11 = vcmp.eq.f32.partialorder %v1705_v37, 8.507059e+37  ;;  %v1708_v2 = vor.u32 1.1754944e-38, %v1707_v20 }
 0x287   :  { %v3065_v50 = vpop.eup %2195  ;;  %v1685_v48 = vadd.f32 %v2192_v36, %v1684_v49  ;;  %v1262_v56 = vmul.f32 1.442695, %v1200_v46 }
 0x288   :  { %v1351_v59 = vadd.f32 1.0, %v3065_v50  ;;  %v1071_v41 = vpop.xlane.xlu1 %1070 }
 0x289   :  { %v1689_v52 = vsel %vm1688_vm4, %v2192_v36, %v1685_v48  ;;  %2199 = vpow2.f32 %v1262_v56  ;;  %v3069_v1 = vadd.f32 %v2867_v63, %v1071_v41 }
 0x28a   :  { %v1694_v4 = vsel %vm1691_vm5, %v1693_v19, %v1689_v52  ;;  %2201 = vrcp.f32 %v1351_v59  ;;  %v2198_v43 = vpop.eup %2197  ;;  %v1720_v23 = vand.u32 2147483647, %v1351_v59  ;;  %v1722_v5 = vand.u32 2147483648, %v1351_v59 }
 0x28b   :  { %v1957_v44 = vmul.f32 %v3038_v12, %v1694_v4  ;;  %v1163_v6 = vand.u32 2147483647, %v3069_v1  ;;  %v1697_v7 = vmul.f32 %v2198_v43, %v1350_v45  ;;  %vm1702_vm8 = vweird.f32 %v2198_v43 }
 0x28c   :  { %vm1703_vm10 = vmor %vm1701_vm9, %vm1702_vm8  ;;  %vm1716_vm13 = vweird.f32 %v1351_v59  ;;  %v1723_v33 = vor.u32 1.1754944e-38, %v1722_v5  ;;  %vm1721_vm0 = vcmp.eq.f32.partialorder %v1720_v23, 8.507059e+37 }
 0x28d   :  { %v1995_v61 = vsel %vm1311_vm7, %v1694_v4, %v1957_v44  ;;  %v1201_v9 = vsub.f32 0.0, %v1163_v6  ;;  %v1698_v51 = vsub.f32 1.0, %v1697_v7  ;;  %vm1314_vm7 = vcmp.ge.f32.partialorder %v3053_v38, 0.0 }
 0x28e   :  { %2034 = vst.msk [vmem:[%s3273_s7 + $0xa8] sm:$0xff] %vm2012_vm6, %v1995_v61 }
 0x28f   :  { %v3078_v0 = vpop.eup %2199  ;;  %v1264_v12 = vmul.f32 1.442695, %v1201_v9  ;;  %v1699_v39 = vmul.f32 %v2198_v43, %v1698_v51 }
 0x290   :  { %v2202_v11 = vpop.eup %2201  ;;  %v3081_v47 = vadd.f32 1.0, %v3078_v0  ;;  %v1073_v18 = vpop.xlane.xlu2 %1072 }
 0x291   :  { %v1712_v8 = vmul.f32 %v2202_v11, %v1351_v59  ;;  %v3084_v3 = vadd.f32 %v2867_v63, %v1073_v18  ;;  %v1700_v15 = vadd.f32 %v2198_v43, %v1699_v39  ;;  %vm1717_vm12 = vweird.f32 %v2202_v11 }
 0x292   :  { %2203 = vrcp.f32 %v3081_v47  ;;  %vm1718_vm15 = vmor %vm1716_vm13, %vm1717_vm12  ;;  %v1735_v40 = vand.u32 2147483647, %v3081_v47  ;;  %vm1731_vm3 = vweird.f32 %v3081_v47  ;;  %vm1315_vm12 = vcmp.ge.f32.partialorder %v3069_v1, 0.0 }
 0x293   :  { %v1713_v16 = vsub.f32 1.0, %v1712_v8  ;;  %2205 = vpow2.f32 %v1264_v12  ;;  %v1164_v22 = vand.u32 2147483647, %v3084_v3  ;;  %v1704_v27 = vsel %vm1703_vm10, %v2198_v43, %v1700_v15 }
 0x294   :  { %v1709_v57 = vsel %vm1706_vm11, %v1708_v2, %v1704_v27  ;;  %vm1736_vm5 = vcmp.eq.f32.partialorder %v1735_v40, 8.507059e+37 }
 0x295   :  { %v1714_v24 = vmul.f32 %v2202_v11, %v1713_v16  ;;  %v1202_v31 = vsub.f32 0.0, %v1164_v22  ;;  %v1958_v54 = vmul.f32 %v3056_v34, %v1709_v57  ;;  %v1737_v34 = vand.u32 2147483648, %v3081_v47 }
 0x297   :  { %v1715_v29 = vadd.f32 %v2202_v11, %v1714_v24  ;;  %v1266_v32 = vmul.f32 1.442695, %v1202_v31  ;;  %v1996_v14 = vsel %vm1312_vm14, %v1709_v57, %v1958_v54  ;;  %v1738_v49 = vor.u32 1.1754944e-38, %v1737_v34 }
 0x298   :  { %v2204_v13 = vpop.eup %2203  ;;  %v1075_v62 = vpop.xlane.xlu0 %1074  ;;  %2035 = vst.msk [vmem:[%s3273_s7 + $0xb0] sm:$0xff] %vm2012_vm6, %v1996_v14 }
 0x299   :  { %v3090_v60 = vpop.eup %2205  ;;  %v1719_v21 = vsel %vm1718_vm15, %v2202_v11, %v1715_v29  ;;  %v1727_v36 = vmul.f32 %v2204_v13, %v3081_v47  ;;  %2207 = vpow2.f32 %v1266_v32  ;;  %v3099_v10 = vadd.f32 %v2867_v63, %v1075_v62 }
 0x29a   :  { %v1724_v26 = vsel %vm1721_vm0, %v1723_v33, %v1719_v21  ;;  %v1353_v30 = vadd.f32 1.0, %v3090_v60  ;;  %vm1732_vm2 = vweird.f32 %v2204_v13 }
 0x29b   :  { %v1959_v53 = vmul.f32 %v3065_v50, %v1724_v26  ;;  %v1728_v35 = vsub.f32 1.0, %v1727_v36  ;;  %v1165_v42 = vand.u32 2147483647, %v3099_v10  ;;  %vm1733_vm4 = vmor %vm1731_vm3, %vm1732_vm2 }
 0x29c   :  { %2209 = vrcp.f32 %v1353_v30  ;;  %v1752_v61 = vand.u32 2147483648, %v1353_v30  ;;  %v1750_v9 = vand.u32 2147483647, %v1353_v30  ;;  %vm1746_vm9 = vweird.f32 %v1353_v30 }
 0x29d   :  { %v1997_v25 = vsel %vm1313_vm1, %v1724_v26, %v1959_v53  ;;  %v1729_v28 = vmul.f32 %v2204_v13, %v1728_v35  ;;  %v1203_v46 = vsub.f32 0.0, %v1165_v42  ;;  %vm1316_vm1 = vcmp.ge.f32.partialorder %v3084_v3, 0.0 }
 0x29e   :  { %2036 = vst.msk [vmem:[%s3273_s7 + $0xb8] sm:$0xff] %vm2012_vm6, %v1997_v25  ;;  %v1753_v47 = vor.u32 1.1754944e-38, %v1752_v61  ;;  %vm1751_vm11 = vcmp.eq.f32.partialorder %v1750_v9, 8.507059e+37 }
 0x29f   :  { %v1730_v45 = vadd.f32 %v2204_v13, %v1729_v28  ;;  %v3111_v58 = vpop.eup %2207  ;;  %v1268_v56 = vmul.f32 1.442695, %v1203_v46 }
 0x2a0   :  { %v1077_v17 = vpop.xlane.xlu1 %1076  ;;  %v1354_v48 = vadd.f32 1.0, %v3111_v58 }
 0x2a1   :  { %v3114_v55 = vadd.f32 %v2867_v63, %v1077_v17  ;;  %v1734_v50 = vsel %vm1733_vm4, %v2204_v13, %v1730_v45 }
 0x2a2   :  { %v2210_v19 = vpop.eup %2209  ;;  %v1739_v59 = vsel %vm1736_vm5, %v1738_v49, %v1734_v50  ;;  %2211 = vrcp.f32 %v1354_v48  ;;  %v1767_v2 = vand.u32 2147483648, %v1354_v48  ;;  %v1765_v5 = vand.u32 2147483647, %v1354_v48 }
 0x2a3   :  { %v1166_v41 = vand.u32 2147483647, %v3114_v55  ;;  %v1960_v52 = vmul.f32 %v3078_v0, %v1739_v59  ;;  %v1742_v4 = vmul.f32 %v2210_v19, %v1353_v30  ;;  %2213 = vpow2.f32 %v1268_v56 }
 0x2a4   :  { %vm1747_vm8 = vweird.f32 %v2210_v19  ;;  %vm1761_vm14 = vweird.f32 %v1354_v48  ;;  %v1768_v32 = vor.u32 1.1754944e-38, %v1767_v2  ;;  %vm1766_vm0 = vcmp.eq.f32.partialorder %v1765_v5, 8.507059e+37 }
 0x2a5   :  { %v1998_v44 = vsel %vm1314_vm7, %v1739_v59, %v1960_v52  ;;  %v1743_v6 = vsub.f32 1.0, %v1742_v4  ;;  %v1204_v43 = vsub.f32 0.0, %v1166_v41  ;;  %vm1748_vm10 = vmor %vm1746_vm9, %vm1747_vm8  ;;  %vm1317_vm8 = vcmp.ge.f32.partialorder %v3099_v10, 0.0 }
 0x2a6   :  { %2037 = vst.msk [vmem:[%s3273_s7 + $0xc0] sm:$0xff] %vm2012_vm6, %v1998_v44 }
 0x2a7   :  { %v1744_v7 = vmul.f32 %v2210_v19, %v1743_v6  ;;  %v1270_v51 = vmul.f32 1.442695, %v1204_v43 }
 0x2a8   :  { %v1079_v11 = vpop.xlane.xlu2 %1078  ;;  %v2212_v0 = vpop.eup %2211 }
 0x2a9   :  { %v1745_v37 = vadd.f32 %v2210_v19, %v1744_v7  ;;  %2215 = vpow2.f32 %v1270_v51  ;;  %v3125_v38 = vadd.f32 %v2867_v63, %v1079_v11  ;;  %v3127_v20 = vpop.eup %2213  ;;  %v1757_v12 = vmul.f32 %v2212_v0, %v1354_v48 }
 0x2aa   :  { %v1355_v39 = vadd.f32 1.0, %v3127_v20  ;;  %vm1762_vm13 = vweird.f32 %v2212_v0 }
 0x2ab   :  { %v1749_v18 = vsel %vm1748_vm10, %v2210_v19, %v1745_v37  ;;  %v1167_v8 = vand.u32 2147483647, %v3125_v38  ;;  %v1758_v16 = vsub.f32 1.0, %v1757_v12  ;;  %vm1763_vm15 = vmor %vm1761_vm14, %vm1762_vm13 }
 0x2ac   :  { %v1754_v15 = vsel %vm1751_vm11, %v1753_v47, %v1749_v18  ;;  %2217 = vrcp.f32 %v1355_v39  ;;  %v1780_v35 = vand.u32 2147483647, %v1355_v39  ;;  %v1782_v40 = vand.u32 2147483648, %v1355_v39  ;;  %v3168_v47 = vld [vmem:[#allocation2] ss:$0 sm:$0xff] }
 0x2ad   :  { %v1961_v22 = vmul.f32 %v3090_v60, %v1754_v15  ;;  %v1759_v23 = vmul.f32 %v2212_v0, %v1758_v16  ;;  %v1205_v27 = vsub.f32 0.0, %v1167_v8  ;;  %vm1776_vm3 = vweird.f32 %v1355_v39 }
 0x2ae   :  { %vm1781_vm5 = vcmp.eq.f32.partialorder %v1780_v35, 8.507059e+37  ;;  %v1783_v49 = vor.u32 1.1754944e-38, %v1782_v40 }
 0x2af   :  { %v3133_v24 = vpop.eup %2215  ;;  %v1999_v31 = vsel %vm1315_vm12, %v1754_v15, %v1961_v22  ;;  %v1760_v57 = vadd.f32 %v2212_v0, %v1759_v23  ;;  %v1272_v54 = vmul.f32 1.442695, %v1205_v27  ;;  %vm1318_vm12 = vcmp.ge.f32.partialorder %v3114_v55, 0.0 }
 0x2b0   :  { %2038 = vst.msk [vmem:[%s3273_s7 + $0xc8] sm:$0xff] %vm2012_vm6, %v1999_v31  ;;  %v1356_v1 = vadd.f32 1.0, %v3133_v24  ;;  %v1081_v29 = vpop.xlane.xlu0 %1080 }
 0x2b1   :  { %v3141_v13 = vadd.f32 %v2867_v63, %v1081_v29  ;;  %v1764_v33 = vsel %vm1763_vm15, %v2212_v0, %v1760_v57 }
 0x2b2   :  { %2219 = vrcp.f32 %v1356_v1  ;;  %v2218_v62 = vpop.eup %2217  ;;  %v1769_v60 = vsel %vm1766_vm0, %v1768_v32, %v1764_v33  ;;  %v1795_v19 = vand.u32 2147483647, %v1356_v1  ;;  %v1797_v59 = vand.u32 2147483648, %v1356_v1 }
 0x2b3   :  { %2221 = vpow2.f32 %v1272_v54  ;;  %v1168_v14 = vand.u32 2147483647, %v3141_v13  ;;  %v1962_v21 = vmul.f32 %v3111_v58, %v1769_v60  ;;  %v1772_v36 = vmul.f32 %v2218_v62, %v1355_v39 }
 0x2b4   :  { %vm1777_vm2 = vweird.f32 %v2218_v62  ;;  %vm1791_vm9 = vweird.f32 %v1356_v1  ;;  %v1798_v7 = vor.u32 1.1754944e-38, %v1797_v59  ;;  %vm1796_vm11 = vcmp.eq.f32.partialorder %v1795_v19, 8.507059e+37 }
 0x2b5   :  { %v1206_v26 = vsub.f32 0.0, %v1168_v14  ;;  %v2000_v30 = vsel %vm1316_vm1, %v1769_v60, %v1962_v21  ;;  %v1773_v53 = vsub.f32 1.0, %v1772_v36  ;;  %vm1778_vm4 = vmor %vm1776_vm3, %vm1777_vm2  ;;  %vm1319_vm2 = vcmp.ge.f32.partialorder %v3125_v38, 0.0 }
 0x2b6   :  { %2039 = vst.msk [vmem:[%s3273_s7 + $0xd0] sm:$0xff] %vm2012_vm6, %v2000_v30 }
 0x2b7   :  { %v1274_v34 = vmul.f32 1.442695, %v1206_v26  ;;  %v1774_v28 = vmul.f32 %v2218_v62, %v1773_v53 }
 0x2b8   :  { %v2220_v25 = vpop.eup %2219  ;;  %v1083_v42 = vpop.xlane.xlu1 %1082 }
 0x2b9   :  { %v3150_v45 = vpop.eup %2221  ;;  %v1787_v46 = vmul.f32 %v2220_v25, %v1356_v1  ;;  %2223 = vpow2.f32 %v1274_v34  ;;  %v3153_v3 = vadd.f32 %v2867_v63, %v1083_v42  ;;  %v1775_v17 = vadd.f32 %v2218_v62, %v1774_v28 }
 0x2ba   :  { %v1357_v58 = vadd.f32 1.0, %v3150_v45  ;;  %vm1792_vm7 = vweird.f32 %v2220_v25 }
 0x2bb   :  { %v1788_v50 = vsub.f32 1.0, %v1787_v46  ;;  %v1169_v48 = vand.u32 2147483647, %v3153_v3  ;;  %v1779_v56 = vsel %vm1778_vm4, %v2218_v62, %v1775_v17  ;;  %vm1793_vm10 = vmor %vm1791_vm9, %vm1792_vm7  ;;  %vm1320_vm7 = vcmp.ge.f32.partialorder %v3141_v13, 0.0 }
 0x2bc   :  { %2225 = vrcp.f32 %v1357_v58  ;;  %v1784_v41 = vsel %vm1781_vm5, %v1783_v49, %v1779_v56  ;;  %v1810_v8 = vand.u32 2147483647, %v1357_v58  ;;  %v1812_v15 = vand.u32 2147483648, %v1357_v58 }
 0x2bd   :  { %v1789_v52 = vmul.f32 %v2220_v25, %v1788_v50  ;;  %v1207_v4 = vsub.f32 0.0, %v1169_v48  ;;  %v1963_v63 = vmul.f32 %v3127_v20, %v1784_v41  ;;  %vm1806_vm14 = vweird.f32 %v1357_v58 }
 0x2be   :  { %vm1811_vm0 = vcmp.eq.f32.partialorder %v1810_v8, 8.507059e+37  ;;  %v1813_v57 = vor.u32 1.1754944e-38, %v1812_v15 }
 0x2bf   :  { %v3158_v44 = vpop.eup %2223  ;;  %v1790_v6 = vadd.f32 %v2220_v25, %v1789_v52  ;;  %v1276_v43 = vmul.f32 1.442695, %v1207_v4  ;;  %v2001_v61 = vsel %vm1317_vm8, %v1784_v41, %v1963_v63 }
 0x2c0   :  { %v1358_v9 = vadd.f32 1.0, %v3158_v44  ;;  %2040 = vst.msk [vmem:[%s3273_s7 + $0xd8] sm:$0xff] %vm2012_vm6, %v2001_v61  ;;  %v1085_v11 = vpop.xlane.xlu2 %1084 }
 0x2c1   :  { %v1794_v51 = vsel %vm1793_vm10, %v2220_v25, %v1790_v6  ;;  %2227 = vpow2.f32 %v1276_v43  ;;  %v3171_v12 = vadd.f32 %v3168_v47, %v1085_v11 }
 0x2c2   :  { %v2226_v0 = vpop.eup %2225  ;;  %v1799_v37 = vsel %vm1796_vm11, %v1798_v7, %v1794_v51  ;;  %2229 = vrcp.f32 %v1358_v9  ;;  %v1825_v62 = vand.u32 2147483647, %v1358_v9  ;;  %v1827_v60 = vand.u32 2147483648, %v1358_v9 }
 0x2c3   :  { %v1964_v10 = vmul.f32 %v3133_v24, %v1799_v37  ;;  %v1802_v20 = vmul.f32 %v2226_v0, %v1357_v58  ;;  %v1170_v16 = vand.u32 2147483647, %v3171_v12  ;;  %vm1807_vm13 = vweird.f32 %v2226_v0 }
 0x2c4   :  { %vm1808_vm15 = vmor %vm1806_vm14, %vm1807_vm13  ;;  %vm1821_vm3 = vweird.f32 %v1358_v9  ;;  %v1828_v40 = vor.u32 1.1754944e-38, %v1827_v60  ;;  %vm1826_vm5 = vcmp.eq.f32.partialorder %v1825_v62, 8.507059e+37 }
 0x2c5   :  { %v2002_v18 = vsel %vm1318_vm12, %v1799_v37, %v1964_v10  ;;  %v1803_v39 = vsub.f32 1.0, %v1802_v20  ;;  %v1208_v5 = vsub.f32 0.0, %v1170_v16  ;;  %vm1321_vm12 = vcmp.ge.f32.partialorder %v3153_v3, 0.0 }
 0x2c6   :  { %2041 = vst.msk [vmem:[%s3273_s7 + $0xe0] sm:$0xff] %vm2012_vm6, %v2002_v18 }
 0x2c7   :  { %v3178_v22 = vpop.eup %2227  ;;  %v1804_v2 = vmul.f32 %v2226_v0, %v1803_v39  ;;  %v1278_v29 = vmul.f32 1.442695, %v1208_v5 }
 0x2c8   :  { %v2230_v55 = vpop.eup %2229  ;;  %v1359_v23 = vadd.f32 1.0, %v3178_v22  ;;  %v1087_v31 = vpop.xlane.xlu0 %1086 }
 0x2c9   :  { %v1805_v27 = vadd.f32 %v2226_v0, %v1804_v2  ;;  %v1817_v24 = vmul.f32 %v2230_v55, %v1358_v9  ;;  %v3182_v32 = vadd.f32 %v3168_v47, %v1087_v31  ;;  %vm1822_vm1 = vweird.f32 %v2230_v55 }
 0x2ca   :  { %2231 = vrcp.f32 %v1359_v23  ;;  %vm1823_vm4 = vmor %vm1821_vm3, %vm1822_vm1  ;;  %v1842_v49 = vand.u32 2147483648, %v1359_v23  ;;  %v1840_v59 = vand.u32 2147483647, %v1359_v23  ;;  %vm1836_vm9 = vweird.f32 %v1359_v23 }
 0x2cb   :  { %v1809_v1 = vsel %vm1808_vm15, %v2226_v0, %v1805_v27  ;;  %v1818_v54 = vsub.f32 1.0, %v1817_v24  ;;  %2233 = vpow2.f32 %v1278_v29  ;;  %v1171_v36 = vand.u32 2147483647, %v3182_v32 }
 0x2cc   :  { %v1814_v33 = vsel %vm1811_vm0, %v1813_v57, %v1809_v1  ;;  %v1843_v63 = vor.u32 1.1754944e-38, %v1842_v49  ;;  %vm1841_vm11 = vcmp.eq.f32.partialorder %v1840_v59, 8.507059e+37 }
 0x2cd   :  { %v1965_v14 = vmul.f32 %v3150_v45, %v1814_v33  ;;  %v1819_v21 = vmul.f32 %v2230_v55, %v1818_v54  ;;  %v1209_v53 = vsub.f32 0.0, %v1171_v36 }
 0x2cf   :  { %v2003_v26 = vsel %vm1319_vm2, %v1814_v33, %v1965_v14  ;;  %v1820_v30 = vadd.f32 %v2230_v55, %v1819_v21  ;;  %v1089_v34 = vpop.xlane.xlu1 %1088  ;;  %v1280_v42 = vmul.f32 1.442695, %v1209_v53  ;;  %vm1322_vm2 = vcmp.ge.f32.partialorder %v3171_v12, 0.0 }
 0x2d0   :  { %v2232_v35 = vpop.eup %2231  ;;  %2042 = vst.msk [vmem:[%s3273_s7 + $0xe8] sm:$0xff] %vm2012_vm6, %v2003_v26  ;;  %v3192_v38 = vadd.f32 %v3168_v47, %v1089_v34 }
 0x2d1   :  { %v1824_v25 = vsel %vm1823_vm4, %v2230_v55, %v1820_v30  ;;  %v1832_v28 = vmul.f32 %v2232_v35, %v1359_v23  ;;  %v3194_v46 = vpop.eup %2233  ;;  %2235 = vpow2.f32 %v1280_v42  ;;  %vm1837_vm8 = vweird.f32 %v2232_v35 }
 0x2d2   :  { %v1829_v45 = vsel %vm1826_vm5, %v1828_v40, %v1824_v25  ;;  %v1360_v50 = vadd.f32 1.0, %v3194_v46  ;;  %v1172_v48 = vand.u32 2147483647, %v3192_v38  ;;  %vm1838_vm10 = vmor %vm1836_vm9, %vm1837_vm8 }
 0x2d3   :  { %v1966_v17 = vmul.f32 %v3158_v44, %v1829_v45  ;;  %v1833_v58 = vsub.f32 1.0, %v1832_v28 }
 0x2d4   :  { %2237 = vrcp.f32 %v1360_v50  ;;  %v1210_v4 = vsub.f32 0.0, %v1172_v48  ;;  %v1855_v15 = vand.u32 2147483647, %v1360_v50  ;;  %v1857_v16 = vand.u32 2147483648, %v1360_v50 }
 0x2d5   :  { %v2004_v56 = vsel %vm1320_vm7, %v1829_v45, %v1966_v17  ;;  %v1834_v19 = vmul.f32 %v2232_v35, %v1833_v58  ;;  %vm1851_vm14 = vweird.f32 %v1360_v50  ;;  %vm1323_vm7 = vcmp.ge.f32.partialorder %v3182_v32, 0.0 }
 0x2d6   :  { %2043 = vst.msk [vmem:[%s3273_s7 + $0xf0] sm:$0xff] %vm2012_vm6, %v2004_v56  ;;  %v1282_v43 = vmul.f32 1.442695, %v1210_v4  ;;  %vm1856_vm0 = vcmp.eq.f32.partialorder %v1855_v15, 8.507059e+37  ;;  %v1858_v31 = vor.u32 1.1754944e-38, %v1857_v16 }
 0x2d7   :  { %v1091_v41 = vpop.xlane.xlu2 %1090  ;;  %v1835_v52 = vadd.f32 %v2232_v35, %v1834_v19  ;;  %v3207_v44 = vpop.eup %2235 }
 0x2d8   :  { %v3205_v13 = vadd.f32 %v3168_v47, %v1091_v41  ;;  %v1361_v9 = vadd.f32 1.0, %v3207_v44  ;;  %2239 = vpow2.f32 %v1282_v43 }
 0x2d9   :  { %v1839_v6 = vsel %vm1838_vm10, %v2232_v35, %v1835_v52 }
 0x2da   :  { %v1173_v61 = vand.u32 2147483647, %v3205_v13  ;;  %v1844_v7 = vsel %vm1841_vm11, %v1843_v63, %v1839_v6  ;;  %v2238_v0 = vpop.eup %2237  ;;  %2241 = vrcp.f32 %v1361_v9  ;;  %v1870_v29 = vand.u32 2147483647, %v1361_v9 }
 0x2db   :  { %v1967_v51 = vmul.f32 %v3178_v22, %v1844_v7  ;;  %v1847_v10 = vmul.f32 %v2238_v0, %v1360_v50  ;;  %vm1852_vm13 = vweird.f32 %v2238_v0  ;;  %v1872_v60 = vand.u32 2147483648, %v1361_v9 }
 0x2dc   :  { %v1211_v11 = vsub.f32 0.0, %v1173_v61  ;;  %vm1853_vm15 = vmor %vm1851_vm14, %vm1852_vm13  ;;  %vm1866_vm3 = vweird.f32 %v1361_v9  ;;  %vm1871_vm5 = vcmp.eq.f32.partialorder %v1870_v29, 8.507059e+37  ;;  %vm1324_vm14 = vcmp.ge.f32.partialorder %v3192_v38, 0.0 }
 0x2dd   :  { %v2005_v37 = vsel %vm1321_vm12, %v1844_v7, %v1967_v51  ;;  %v1848_v8 = vsub.f32 1.0, %v1847_v10  ;;  %v1873_v25 = vor.u32 1.1754944e-38, %v1872_v60 }
 0x2de   :  { %v1284_v20 = vmul.f32 1.442695, %v1211_v11  ;;  %2044 = vst.msk [vmem:[%s3273_s7 + $0xf8] sm:$0xff] %vm2012_vm6, %v2005_v37  ;;  %v3221_v3 = vpop.eup %2239 }
 0x2df   :  { %v1093_v18 = vpop.xlane.xlu0 %1092  ;;  %v1849_v2 = vmul.f32 %v2238_v0, %v1848_v8  ;;  %v1362_v23 = vadd.f32 1.0, %v3221_v3 }
 0x2e0   :  { %v3218_v39 = vadd.f32 %v3168_v47, %v1093_v18  ;;  %2243 = vpow2.f32 %v1284_v20  ;;  %v2242_v55 = vpop.eup %2241 }
 0x2e1   :  { %v1850_v27 = vadd.f32 %v2238_v0, %v1849_v2  ;;  %v1862_v24 = vmul.f32 %v2242_v55, %v1361_v9  ;;  %2245 = vrcp.f32 %v1362_v23  ;;  %vm1867_vm1 = vweird.f32 %v2242_v55 }
 0x2e2   :  { %v1174_v22 = vand.u32 2147483647, %v3218_v39  ;;  %vm1868_vm4 = vmor %vm1866_vm3, %vm1867_vm1  ;;  %v1885_v50 = vand.u32 2147483647, %v1362_v23  ;;  %v1887_v48 = vand.u32 2147483648, %v1362_v23  ;;  %vm1881_vm9 = vweird.f32 %v1362_v23 }
 0x2e3   :  { %v1854_v1 = vsel %vm1853_vm15, %v2238_v0, %v1850_v27  ;;  %v1863_v54 = vsub.f32 1.0, %v1862_v24  ;;  %vm1325_vm1 = vcmp.ge.f32.partialorder %v3205_v13, 0.0 }
 0x2e4   :  { %v1212_v5 = vsub.f32 0.0, %v1174_v22  ;;  %v1859_v62 = vsel %vm1856_vm0, %v1858_v31, %v1854_v1  ;;  %vm1886_vm11 = vcmp.eq.f32.partialorder %v1885_v50, 8.507059e+37  ;;  %v1888_v32 = vor.u32 1.1754944e-38, %v1887_v48 }
 0x2e5   :  { %v1968_v36 = vmul.f32 %v3194_v46, %v1859_v62  ;;  %v1864_v26 = vmul.f32 %v2242_v55, %v1863_v54 }
 0x2e6   :  { %v3224_v57 = vpop.eup %2243  ;;  %v1286_v33 = vmul.f32 1.442695, %v1212_v5 }
 0x2e7   :  { %v1363_v14 = vadd.f32 1.0, %v3224_v57  ;;  %v1095_v21 = vpop.xlane.xlu1 %1094  ;;  %v2006_v53 = vsel %vm1322_vm2, %v1859_v62, %v1968_v36  ;;  %v1865_v35 = vadd.f32 %v2242_v55, %v1864_v26  ;;  %v2246_v34 = vpop.eup %2245 }
 0x2e8   :  { %2247 = vpow2.f32 %v1286_v33  ;;  %v3229_v30 = vadd.f32 %v3168_v47, %v1095_v21  ;;  %2045 = vst.msk [vmem:[%s3273_s7 + $0x100] sm:$0xff] %vm2012_vm6, %v2006_v53  ;;  %v1877_v47 = vmul.f32 %v2246_v34, %v1362_v23  ;;  %vm1882_vm8 = vweird.f32 %v2246_v34 }
 0x2e9   :  { %2249 = vrcp.f32 %v1363_v14  ;;  %v1869_v28 = vsel %vm1868_vm4, %v2242_v55, %v1865_v35  ;;  %vm1883_vm10 = vmor %vm1881_vm9, %vm1882_vm8  ;;  %v1902_v63 = vand.u32 2147483648, %v1363_v14  ;;  %v1900_v43 = vand.u32 2147483647, %v1363_v14 }
 0x2ea   :  { %v1175_v40 = vand.u32 2147483647, %v3229_v30  ;;  %v1874_v12 = vsel %vm1871_vm5, %v1873_v25, %v1869_v28  ;;  %v1878_v17 = vsub.f32 1.0, %v1877_v47  ;;  %vm1896_vm13 = vweird.f32 %v1363_v14 }
 0x2eb   :  { %v1969_v46 = vmul.f32 %v3207_v44, %v1874_v12  ;;  %v1903_v11 = vor.u32 1.1754944e-38, %v1902_v63  ;;  %vm1901_vm0 = vcmp.eq.f32.partialorder %v1900_v43, 8.507059e+37 }
 0x2ec   :  { %v1213_v42 = vsub.f32 0.0, %v1175_v40  ;;  %v1879_v59 = vmul.f32 %v2246_v34, %v1878_v17 }
 0x2ed   :  { %v2007_v19 = vsel %vm1323_vm7, %v1874_v12, %v1969_v46  ;;  %vm1326_vm7 = vcmp.ge.f32.partialorder %v3218_v39, 0.0 }
 0x2ee   :  { %v2248_v45 = vpop.eup %2247  ;;  %v1288_v58 = vmul.f32 1.442695, %v1213_v42  ;;  %2046 = vst.msk [vmem:[%s3273_s7 + $0x108] sm:$0xff] %vm2012_vm6, %v2007_v19  ;;  %v1880_v52 = vadd.f32 %v2246_v34, %v1879_v59 }
 0x2ef   :  { %v2250_v49 = vpop.eup %2249  ;;  %v1364_v56 = vadd.f32 1.0, %v2248_v45 }
 0x2f0   :  { %v1892_v41 = vmul.f32 %v2250_v49, %v1363_v14  ;;  %v1884_v44 = vsel %vm1883_vm10, %v2246_v34, %v1880_v52  ;;  %vm1897_vm12 = vweird.f32 %v2250_v49 }
 0x2f1   :  { %2251 = vrcp.f32 %v1364_v56  ;;  %v1889_v61 = vsel %vm1886_vm11, %v1888_v32, %v1884_v44  ;;  %vm1898_vm15 = vmor %vm1896_vm13, %vm1897_vm12  ;;  %v1917_v38 = vand.u32 2147483648, %v1364_v56  ;;  %v1915_v2 = vand.u32 2147483647, %v1364_v56 }
 0x2f2   :  { %v1893_v4 = vsub.f32 1.0, %v1892_v41  ;;  %2253 = vpow2.f32 %v1288_v58  ;;  %v1970_v7 = vmul.f32 %v3221_v3, %v1889_v61  ;;  %vm1911_vm3 = vweird.f32 %v1364_v56 }
 0x2f3   :  { %v1918_v23 = vor.u32 1.1754944e-38, %v1917_v38  ;;  %vm1916_vm5 = vcmp.eq.f32.partialorder %v1915_v2, 8.507059e+37  ;;  %vm1327_vm12 = vcmp.ge.f32.partialorder %v3229_v30, 0.0 }
 0x2f4   :  { %v1894_v6 = vmul.f32 %v2250_v49, %v1893_v4  ;;  %v2008_v37 = vsel %vm1324_vm14, %v1889_v61, %v1970_v7 }
 0x2f5   :  { %2047 = vst.msk [vmem:[%s3273_s7 + $0x110] sm:$0xff] %vm2012_vm6, %v2008_v37 }
 0x2f6   :  { %v1895_v9 = vadd.f32 %v2250_v49, %v1894_v6 }
 0x2f7   :  { %v2252_v51 = vpop.eup %2251 }
 0x2f8   :  { %v2254_v0 = vpop.eup %2253  ;;  %v1899_v10 = vsel %vm1898_vm15, %v2250_v49, %v1895_v9  ;;  %v1907_v20 = vmul.f32 %v2252_v51, %v1364_v56  ;;  %vm1912_vm2 = vweird.f32 %v2252_v51 }
 0x2f9   :  { %v1904_v18 = vsel %vm1901_vm0, %v1903_v11, %v1899_v10  ;;  %v1365_v8 = vadd.f32 1.0, %v2254_v0  ;;  %vm1913_vm4 = vmor %vm1911_vm3, %vm1912_vm2 }
 0x2fa   :  { %v1971_v15 = vmul.f32 %v3224_v57, %v1904_v18  ;;  %v1908_v16 = vsub.f32 1.0, %v1907_v20 }
 0x2fb   :  { %2255 = vrcp.f32 %v1365_v8  ;;  %v1932_v54 = vand.u32 2147483648, %v1365_v8  ;;  %v1930_v33 = vand.u32 2147483647, %v1365_v8  ;;  %vm1926_vm9 = vweird.f32 %v1365_v8 }
 0x2fc   :  { %v2009_v22 = vsel %vm1325_vm1, %v1904_v18, %v1971_v15  ;;  %v1909_v3 = vmul.f32 %v2252_v51, %v1908_v16 }
 0x2fd   :  { %2048 = vst.msk [vmem:[%s3273_s7 + $0x118] sm:$0xff] %vm2012_vm6, %v2009_v22  ;;  %v1933_v60 = vor.u32 1.1754944e-38, %v1932_v54  ;;  %vm1931_vm11 = vcmp.eq.f32.partialorder %v1930_v33, 8.507059e+37 }
 0x2fe   :  { %v1910_v55 = vadd.f32 %v2252_v51, %v1909_v3 }
 0x300   :  { %v1914_v5 = vsel %vm1913_vm4, %v2252_v51, %v1910_v55 }
 0x301   :  { %v2256_v27 = vpop.eup %2255  ;;  %v1919_v24 = vsel %vm1916_vm5, %v1918_v23, %v1914_v5 }
 0x302   :  { %v1972_v13 = vmul.f32 %v2248_v45, %v1919_v24  ;;  %v1922_v31 = vmul.f32 %v2256_v27, %v1365_v8  ;;  %vm1927_vm8 = vweird.f32 %v2256_v27 }
 0x303   :  { %vm1928_vm10 = vmor %vm1926_vm9, %vm1927_vm8 }
 0x304   :  { %v2010_v57 = vsel %vm1326_vm7, %v1919_v24, %v1972_v13  ;;  %v1923_v1 = vsub.f32 1.0, %v1922_v31 }
 0x305   :  { %2049 = vst.msk [vmem:[%s3273_s7 + $0x120] sm:$0xff] %vm2012_vm6, %v2010_v57 }
 0x306   :  { %v1924_v29 = vmul.f32 %v2256_v27, %v1923_v1 }
 0x308   :  { %v1925_v62 = vadd.f32 %v2256_v27, %v1924_v29 }
 0x30a   :  { %v1929_v14 = vsel %vm1928_vm10, %v2256_v27, %v1925_v62 }
 0x30b   :  { %v1934_v21 = vsel %vm1931_vm11, %v1933_v60, %v1929_v14 }
 0x30c   :  { %v1973_v36 = vmul.f32 %v2254_v0, %v1934_v21 }
 0x30e   :  { %v2011_v39 = vsel %vm1327_vm12, %v1934_v21, %v1973_v36 }
 0x30f   :  { %2050 = vst.msk [vmem:[%s3273_s7 + $0x128] sm:$0xff] %vm2012_vm6, %v2011_v39 }
 0x310   :  { %2055 = vsyncpa [#allocation4], 1 }
 0x311   :  { %2056 = vsyncpa [#allocation6], 1 }

</bundles_post_ra>
